<compile_context>
chip_gen: v6e
topology: v6e:2x2x1
jax: 0.10.0
libtpu: 0.0.40
codegen_flags: <defaults>
</compile_context>

<pallas_src>
from functools import partial

import numpy as np
import jax
import jax.numpy as jnp
from jax.experimental import pallas as pl
from jax.experimental.pallas import tpu as pltpu

# ---- module hyper-parameters (PyTorch defaults) -----------------------------
INPUT_DIMS = 3
FREQS = 128
SIGMA = 1 << 5            # 32
TN_MAX = 2048             # max rows per grid step (multiple of 256)

# ---- fused sincos constants (Cephes single precision, x2 -> pi/2 split) -----
_TWO_OVER_PI = 0.6366197723675814
_PIO2_HI = 1.5703125                    # exact in f32
_PIO2_MID = 4.837512969970703125e-4
_PIO2_LO = 7.54978995489188216e-8


# ---- Pallas kernel ----------------------------------------------------------
def _fourier_kernel(x_ref, bt_ref, o_ref):
    x = x_ref[...]                      # (TN, INPUT_DIMS)    f32
    bt = bt_ref[...]                    # (INPUT_DIMS, FREQS) f32 (pre-scaled)
    in_dims, freqs = bt.shape

    # K = in_dims = 3: projection on the VPU as broadcast FMAs (keeps the MXU
    # out of a padded K=3 pass; arguments stay full f32).
    mapped = x[:, 0:1] * bt[0:1, :]     # (TN, FREQS)
    for k in range(1, in_dims):
        mapped = mapped + x[:, k:k + 1] * bt[k:k + 1, :]

    # ---- fused sincos: ONE shared range reduction ---------------------------
    # n = round(mapped * 2/pi);  r = mapped - n*pi/2  (Cody-Waite, 3 terms)
    n_f = jnp.floor(mapped * _TWO_OVER_PI + 0.5)   # round-to-nearest (half-up)
    r = mapped - n_f * _PIO2_HI
    r = r - n_f * _PIO2_MID
    r = r - n_f * _PIO2_LO
    z = r * r

    # Minimax polynomials on [-pi/4, pi/4] (Cephes sinf/cosf coefficients).
    sin_r = ((-1.9515295891e-4 * z + 8.3321608736e-3) * z
             - 1.6666654611e-1) * z * r + r
    cos_r = ((2.443315711809948e-5 * z - 1.388731625493765e-3) * z
             + 4.166664568298827e-2) * z * z - 0.5 * z + 1.0

    # Quadrant selection from q = n mod 4.
    q = n_f.astype(jnp.int32) & 3
    swap = (q & 1) != 0
    sin_v = jnp.where(swap, cos_r, sin_r)
    cos_v = jnp.where(swap, sin_r, cos_r)
    sin_v = jnp.where((q & 2) != 0, -sin_v, sin_v)
    cos_v = jnp.where(((q + 1) & 2) != 0, -cos_v, cos_v)

    # Direct half-writes: both slices are 128-lane aligned -> unmasked vst,
    # and no concatenated (TN, 2*FREQS) temporary.
    o_ref[:, :freqs] = sin_v.astype(o_ref.dtype)
    o_ref[:, freqs:] = cos_v.astype(o_ref.dtype)


# ---- wrapper ----------------------------------------------------------------
def _round_up(a, b):
    return ((a + b - 1) // b) * b


@partial(jax.jit, static_argnames=("out_dtype",))
def fourier_encoder_pallas(x, basis, extra_scale=1.0, out_dtype=jnp.float32):
    """x: (..., input_dims); basis: (freqs, input_dims) -> (..., 2*freqs)."""
    batches = x.shape[:-1]
    in_dims = x.shape[-1]
    freqs = basis.shape[0]

    n = int(np.prod(batches)) if batches else 1
    xf = x.reshape(n, in_dims).astype(jnp.float32)

    # Row tile: big enough to amortize the ~0.35us/step pipeline overhead, but
    # no bigger than the (padded) batch for small inputs.  At TN=2048 the
    # double-buffered in+out footprint is ~4 MiB -> fits all scoped defaults,
    # and any n >= 2*TN_MAX still yields >=2 grid steps for megacore sharding.
    tn = min(TN_MAX, _round_up(n, 256))
    n_pad = pl.cdiv(n, tn) * tn
    if n_pad != n:
        xf = jnp.pad(xf, ((0, n_pad - n), (0, 0)))

    # extra_scale applied once wrapper-side; store basis transposed so the
    # kernel reads (in_dims, freqs) rows directly.
    bt = (extra_scale * basis).T.astype(jnp.float32)       # (in_dims, freqs)

    out = pl.pallas_call(
        _fourier_kernel,
        out_shape=jax.ShapeDtypeStruct((n_pad, 2 * freqs), out_dtype),
        grid_spec=pltpu.PrefetchScalarGridSpec(
            num_scalar_prefetch=0,
            grid=(n_pad // tn,),
            in_specs=[
                pl.BlockSpec((tn, in_dims), lambda i: (i, 0)),
                pl.BlockSpec((in_dims, freqs), lambda i: (0, 0)),
            ],
            out_specs=pl.BlockSpec((tn, 2 * freqs), lambda i: (i, 0)),
        ),
        compiler_params=pltpu.CompilerParams(
            dimension_semantics=("parallel",)),
    )(xf, bt)

    return out[:n].reshape(batches + (2 * freqs,))


# ---- basis construction (mirrors create_fourier_basis) ----------------------
def create_fourier_basis(key, freqs=FREQS, features=INPUT_DIMS, freq=SIGMA):
    return float(freq) * jax.random.normal(key, (freqs, features),
                                           dtype=jnp.float32)


# ---- pure-JAX reference (mirrors the PyTorch forward exactly) ---------------
def fourier_encoder_ref(x, basis, extra_scale=1.0):
    mapped = jnp.matmul(x.astype(jnp.float32),
                        (extra_scale * basis).T.astype(jnp.float32),
                        precision=jax.lax.Precision.HIGHEST)
    return jnp.concatenate([jnp.sin(mapped), jnp.cos(mapped)], axis=-1)


# ---- main -------------------------------------------------------------------
if __name__ == "__main__":
    key = jax.random.PRNGKey(0)
    k_x, k_b = jax.random.split(key)

    # x has shape (..., input_dims); batches = (2, 8) -> N = 16 rows
    x = jax.random.normal(k_x, (2, 8, INPUT_DIMS), dtype=jnp.float32)
    basis = create_fourier_basis(k_b)

    out = fourier_encoder_pallas(x, basis)
    out = jax.block_until_ready(out)

    ref = fourier_encoder_ref(x, basis)
    assert out.shape == (2, 8, 2 * FREQS), out.shape
    max_err = float(jnp.max(jnp.abs(out - ref)))
    assert jnp.allclose(out, ref, atol=1e-3, rtol=1e-3), max_err

    print("KERNEL_OK")
</pallas_src>

<mosaic_0001>
module attributes {stable_mosaic.version = 11 : i64} {
  func.func @_fourier_kernel(%arg0: i32, %arg1: memref<256x3xf32, #tpu.memory_space<vmem>>, %arg2: memref<3x128xf32, #tpu.memory_space<vmem>>, %arg3: memref<256x256xf32, #tpu.memory_space<vmem>>) attributes {dimension_semantics = [#tpu.dimension_semantics<parallel>], iteration_bounds = array<i64: 1>, scalar_prefetch = 0 : i64, scratch_operands = 0 : i64, tpu.core_type = #tpu.core_type<tc>, window_params = [{transform_indices = @transform_0, window_bounds = array<i64: 256, 3>}, {pipeline_mode = #tpu.pipeline_mode<synchronous>, transform_indices = @transform_1, window_bounds = array<i64: 3, 128>}, {transform_indices = @transform_2, window_bounds = array<i64: 256, 256>}]} {
    %c0 = arith.constant 0 : index
    %c0_0 = arith.constant 0 : index
    %0 = vector.load %arg1[%c0, %c0_0] : memref<256x3xf32, #tpu.memory_space<vmem>>, vector<256x3xf32>
    %c0_1 = arith.constant 0 : index
    %c0_2 = arith.constant 0 : index
    %1 = vector.load %arg2[%c0_1, %c0_2] : memref<3x128xf32, #tpu.memory_space<vmem>>, vector<3x128xf32>
    %2 = vector.extract_strided_slice %0 {offsets = [0, 0], sizes = [256, 1], strides = [1, 1]} : vector<256x3xf32> to vector<256x1xf32>
    %3 = vector.extract_strided_slice %1 {offsets = [0, 0], sizes = [1, 128], strides = [1, 1]} : vector<3x128xf32> to vector<1x128xf32>
    %4 = vector.broadcast %2 : vector<256x1xf32> to vector<256x128xf32>
    %5 = vector.broadcast %3 : vector<1x128xf32> to vector<256x128xf32>
    %6 = arith.mulf %4, %5 : vector<256x128xf32>
    %7 = vector.extract_strided_slice %0 {offsets = [0, 1], sizes = [256, 1], strides = [1, 1]} : vector<256x3xf32> to vector<256x1xf32>
    %8 = vector.extract_strided_slice %1 {offsets = [1, 0], sizes = [1, 128], strides = [1, 1]} : vector<3x128xf32> to vector<1x128xf32>
    %9 = vector.broadcast %7 : vector<256x1xf32> to vector<256x128xf32>
    %10 = vector.broadcast %8 : vector<1x128xf32> to vector<256x128xf32>
    %11 = arith.mulf %9, %10 : vector<256x128xf32>
    %12 = arith.addf %6, %11 : vector<256x128xf32>
    %13 = vector.extract_strided_slice %0 {offsets = [0, 2], sizes = [256, 1], strides = [1, 1]} : vector<256x3xf32> to vector<256x1xf32>
    %14 = vector.extract_strided_slice %1 {offsets = [2, 0], sizes = [1, 128], strides = [1, 1]} : vector<3x128xf32> to vector<1x128xf32>
    %15 = vector.broadcast %13 : vector<256x1xf32> to vector<256x128xf32>
    %16 = vector.broadcast %14 : vector<1x128xf32> to vector<256x128xf32>
    %17 = arith.mulf %15, %16 : vector<256x128xf32>
    %18 = arith.addf %12, %17 : vector<256x128xf32>
    %cst = arith.constant 0.636619746 : f32
    %19 = vector.broadcast %cst : f32 to vector<256x128xf32>
    %20 = arith.mulf %18, %19 : vector<256x128xf32>
    %cst_3 = arith.constant 5.000000e-01 : f32
    %21 = vector.broadcast %cst_3 : f32 to vector<256x128xf32>
    %22 = arith.addf %20, %21 : vector<256x128xf32>
    %23 = math.floor %22 : vector<256x128xf32>
    %cst_4 = arith.constant 1.5703125 : f32
    %24 = vector.broadcast %cst_4 : f32 to vector<256x128xf32>
    %25 = arith.mulf %23, %24 : vector<256x128xf32>
    %26 = arith.subf %18, %25 : vector<256x128xf32>
    %cst_5 = arith.constant 4.83751297E-4 : f32
    %27 = vector.broadcast %cst_5 : f32 to vector<256x128xf32>
    %28 = arith.mulf %23, %27 : vector<256x128xf32>
    %29 = arith.subf %26, %28 : vector<256x128xf32>
    %cst_6 = arith.constant 7.549790e-08 : f32
    %30 = vector.broadcast %cst_6 : f32 to vector<256x128xf32>
    %31 = arith.mulf %23, %30 : vector<256x128xf32>
    %32 = arith.subf %29, %31 : vector<256x128xf32>
    %33 = arith.mulf %32, %32 : vector<256x128xf32>
    %cst_7 = arith.constant -1.95152956E-4 : f32
    %34 = vector.broadcast %cst_7 : f32 to vector<256x128xf32>
    %35 = arith.mulf %34, %33 : vector<256x128xf32>
    %cst_8 = arith.constant 0.00833216123 : f32
    %36 = vector.broadcast %cst_8 : f32 to vector<256x128xf32>
    %37 = arith.addf %35, %36 : vector<256x128xf32>
    %38 = arith.mulf %37, %33 : vector<256x128xf32>
    %cst_9 = arith.constant 0.166666552 : f32
    %39 = vector.broadcast %cst_9 : f32 to vector<256x128xf32>
    %40 = arith.subf %38, %39 : vector<256x128xf32>
    %41 = arith.mulf %40, %33 : vector<256x128xf32>
    %42 = arith.mulf %41, %32 : vector<256x128xf32>
    %43 = arith.addf %42, %32 : vector<256x128xf32>
    %cst_10 = arith.constant 2.44331568E-5 : f32
    %44 = vector.broadcast %cst_10 : f32 to vector<256x128xf32>
    %45 = arith.mulf %44, %33 : vector<256x128xf32>
    %cst_11 = arith.constant 0.00138873165 : f32
    %46 = vector.broadcast %cst_11 : f32 to vector<256x128xf32>
    %47 = arith.subf %45, %46 : vector<256x128xf32>
    %48 = arith.mulf %47, %33 : vector<256x128xf32>
    %cst_12 = arith.constant 0.0416666456 : f32
    %49 = vector.broadcast %cst_12 : f32 to vector<256x128xf32>
    %50 = arith.addf %48, %49 : vector<256x128xf32>
    %51 = arith.mulf %50, %33 : vector<256x128xf32>
    %52 = arith.mulf %51, %33 : vector<256x128xf32>
    %cst_13 = arith.constant 5.000000e-01 : f32
    %53 = vector.broadcast %cst_13 : f32 to vector<256x128xf32>
    %54 = arith.mulf %53, %33 : vector<256x128xf32>
    %55 = arith.subf %52, %54 : vector<256x128xf32>
    %cst_14 = arith.constant 1.000000e+00 : f32
    %56 = vector.broadcast %cst_14 : f32 to vector<256x128xf32>
    %57 = arith.addf %55, %56 : vector<256x128xf32>
    %58 = arith.fptosi %23 : vector<256x128xf32> to vector<256x128xi32>
    %c3_i32 = arith.constant 3 : i32
    %59 = vector.broadcast %c3_i32 : i32 to vector<256x128xi32>
    %60 = arith.andi %58, %59 : vector<256x128xi32>
    %c1_i32 = arith.constant 1 : i32
    %61 = vector.broadcast %c1_i32 : i32 to vector<256x128xi32>
    %62 = arith.andi %60, %61 : vector<256x128xi32>
    %c0_i32 = arith.constant 0 : i32
    %63 = vector.broadcast %c0_i32 : i32 to vector<256x128xi32>
    %64 = arith.cmpi ne, %62, %63 : vector<256x128xi32>
    %65 = arith.select %64, %57, %43 : vector<256x128xi1>, vector<256x128xf32>
    %66 = arith.select %64, %43, %57 : vector<256x128xi1>, vector<256x128xf32>
    %c2_i32 = arith.constant 2 : i32
    %67 = vector.broadcast %c2_i32 : i32 to vector<256x128xi32>
    %68 = arith.andi %60, %67 : vector<256x128xi32>
    %c0_i32_15 = arith.constant 0 : i32
    %69 = vector.broadcast %c0_i32_15 : i32 to vector<256x128xi32>
    %70 = arith.cmpi ne, %68, %69 : vector<256x128xi32>
    %cst_16 = arith.constant 0.000000e+00 : f32
    %71 = vector.broadcast %cst_16 : f32 to vector<256x128xf32>
    %72 = arith.subf %71, %65 : vector<256x128xf32>
    %73 = arith.select %70, %72, %65 : vector<256x128xi1>, vector<256x128xf32>
    %c1_i32_17 = arith.constant 1 : i32
    %74 = vector.broadcast %c1_i32_17 : i32 to vector<256x128xi32>
    %75 = arith.addi %60, %74 : vector<256x128xi32>
    %c2_i32_18 = arith.constant 2 : i32
    %76 = vector.broadcast %c2_i32_18 : i32 to vector<256x128xi32>
    %77 = arith.andi %75, %76 : vector<256x128xi32>
    %c0_i32_19 = arith.constant 0 : i32
    %78 = vector.broadcast %c0_i32_19 : i32 to vector<256x128xi32>
    %79 = arith.cmpi ne, %77, %78 : vector<256x128xi32>
    %cst_20 = arith.constant 0.000000e+00 : f32
    %80 = vector.broadcast %cst_20 : f32 to vector<256x128xf32>
    %81 = arith.subf %80, %66 : vector<256x128xf32>
    %82 = arith.select %79, %81, %66 : vector<256x128xi1>, vector<256x128xf32>
    %c0_21 = arith.constant 0 : index
    %c0_22 = arith.constant 0 : index
    %83 = vector.load %arg3[%c0_21, %c0_22] : memref<256x256xf32, #tpu.memory_space<vmem>>, vector<256x128xf32>
    tpu.vector_store %arg3[%c0_21, %c0_22], %73 {strides = array<i32>} : memref<256x256xf32, #tpu.memory_space<vmem>>, vector<256x128xf32>,
    %c0_23 = arith.constant 0 : index
    %c128 = arith.constant 128 : index
    %84 = vector.load %arg3[%c0_23, %c128] : memref<256x256xf32, #tpu.memory_space<vmem>>, vector<256x128xf32>
    tpu.vector_store %arg3[%c0_23, %c128], %82 {strides = array<i32>} : memref<256x256xf32, #tpu.memory_space<vmem>>, vector<256x128xf32>,
    return
  }
  func.func @transform_0(%arg0: i32) -> (i32, i32) {
    %c0_i32 = arith.constant 0 : i32
    %c0_i32_0 = arith.constant 0 : i32
    return %arg0, %c0_i32 : i32, i32
  }
  func.func @transform_1(%arg0: i32) -> (i32, i32) {
    %c0_i32 = arith.constant 0 : i32
    %c0_i32_0 = arith.constant 0 : i32
    %c0_i32_1 = arith.constant 0 : i32
    return %c0_i32, %c0_i32_0 : i32, i32
  }
  func.func @transform_2(%arg0: i32) -> (i32, i32) {
    %c0_i32 = arith.constant 0 : i32
    %c0_i32_0 = arith.constant 0 : i32
    return %arg0, %c0_i32 : i32, i32
  }
}

</mosaic_0001>

<bundles_post_ra>
// kernel: fourier_encoder_pallas.1
= control target key start
LH: loop header
LB: loop body
LE: loop exit
PB: predicated region body
PF: predicated region fallthrough
CT: control target
= control target key end

     0   :  { %v2149_v0 = vmov 0   ;;  %v2150_v33 = vmov 1   ;;  %v204_v34 = vlaneseq  ;;  %v2151_v40 = vmov 2   ;;  %s3808_s0 = inlined_call_operand.vmem [shape: f32[256,3], index: 0, kind: input, shape index: {}]   ;;  %s3809_s1 = inlined_call_operand.vmem [shape: f32[3,128], index: 1, kind: input, shape index: {}]   ;;  %s3810_s2 = inlined_call_operand.vmem [shape: f32[256,256], index: 2, kind: output, shape index: {}]  }
   0x1   :  { %2144 = vset.pattern.permute.xlu1 %v2149_v0  ;;  %2143 = vset.pattern.permute.xlu0 %v2149_v0  ;;  %v2170_v1 = vld [vmem:[%s3808_s0 + $0x10] sm:$0xff]  ;;  %v2175_v2 = vld [vmem:[%s3808_s0] sm:$0xff]  ;;  %v2182_v3 = vld [vmem:[%s3808_s0 + $0x18] sm:$0xff] }
   0x2   :  { %56 = vperm.xlu1 %2144, %v2170_v1   ;;  %46 = vperm.xlu0 %2143, %v2175_v2   ;;  %v2187_v4 = vld [vmem:[%s3808_s0 + $0x8] sm:$0xff]  ;;  %v2199_v6 = vld [vmem:[%s3808_s0 + $0x20] sm:$0xff]  ;;  %v2206_v7 = vld [vmem:[%s3808_s0 + $0x38] sm:$0xff]  ;;  %v2395_v37 = vshrl.u32 %v204_v34, 7 }
   0x3   :  { %v2194_v5 = vld [vmem:[%s3808_s0 + $0x28] sm:$0xff]  ;;  %v2211_v8 = vld [vmem:[%s3808_s0 + $0x30] sm:$0xff]  ;;  %v2223_v10 = vld [vmem:[%s3808_s0 + $0x40] sm:$0xff] }
   0x4   :  { %v2218_v9 = vld [vmem:[%s3808_s0 + $0x48] sm:$0xff]  ;;  %v2230_v11 = vld [vmem:[%s3808_s0 + $0x58] sm:$0xff]  ;;  %v2235_v12 = vld [vmem:[%s3808_s0 + $0x50] sm:$0xff]  ;;  %v206_v41 = vsub.s32 0, %v2395_v37 }
   0x5   :  { %v2242_v13 = vld [vmem:[%s3808_s0 + $0x68] sm:$0xff]  ;;  %v2247_v14 = vld [vmem:[%s3808_s0 + $0x60] sm:$0xff]  ;;  %v2254_v15 = vld [vmem:[%s3808_s0 + $0x78] sm:$0xff] }
   0x6   :  { %61 = vperm.xlu1 %2144, %v2182_v3   ;;  %51 = vperm.xlu0 %2143, %v2187_v4   ;;  %v2259_v16 = vld [vmem:[%s3808_s0 + $0x70] sm:$0xff]  ;;  %v2266_v17 = vld [vmem:[%s3808_s0 + $0x88] sm:$0xff]  ;;  %v2271_v18 = vld [vmem:[%s3808_s0 + $0x80] sm:$0xff] }
   0x7   :  { %v2278_v19 = vld [vmem:[%s3808_s0 + $0x98] sm:$0xff]  ;;  %v2283_v20 = vld [vmem:[%s3808_s0 + $0x90] sm:$0xff]  ;;  %v2290_v21 = vld [vmem:[%s3808_s0 + $0xa8] sm:$0xff] }
   0x8   :  { %v2295_v22 = vld [vmem:[%s3808_s0 + $0xa0] sm:$0xff]  ;;  %v2302_v23 = vld [vmem:[%s3808_s0 + $0xb8] sm:$0xff]  ;;  %v2307_v24 = vld [vmem:[%s3808_s0 + $0xb0] sm:$0xff] }
   0x9   :  { %v2314_v25 = vld [vmem:[%s3808_s0 + $0xc8] sm:$0xff]  ;;  %v2319_v26 = vld [vmem:[%s3808_s0 + $0xc0] sm:$0xff]  ;;  %v2326_v27 = vld [vmem:[%s3808_s0 + $0xd8] sm:$0xff] }
   0xa   :  { %71 = vperm.xlu1 %2144, %v2194_v5   ;;  %66 = vperm.xlu0 %2143, %v2199_v6   ;;  %v2331_v28 = vld [vmem:[%s3808_s0 + $0xd0] sm:$0xff]  ;;  %v2338_v29 = vld [vmem:[%s3808_s0 + $0xe8] sm:$0xff]  ;;  %v2343_v30 = vld [vmem:[%s3808_s0 + $0xe0] sm:$0xff] }
   0xb   :  { %v2350_v31 = vld [vmem:[%s3808_s0 + $0xf8] sm:$0xff]  ;;  %v2355_v32 = vld [vmem:[%s3808_s0 + $0xf0] sm:$0xff]  ;;  %v2407_v42 = vld [vmem:[%s3809_s1] sm:$0x7] }
   0xc   :  { %v2414_v45 = vrot.slane %v2407_v42, %v206_v41 }
   0xe   :  { %81 = vperm.xlu1 %2144, %v2206_v7   ;;  %76 = vperm.xlu0 %2143, %v2211_v8  }
  0x12   :  { %91 = vperm.xlu1 %2144, %v2218_v9   ;;  %86 = vperm.xlu0 %2143, %v2223_v10  }
  0x16   :  { %101 = vperm.xlu1 %2144, %v2230_v11   ;;  %96 = vperm.xlu0 %2143, %v2235_v12  }
  0x1a   :  { %111 = vperm.xlu1 %2144, %v2242_v13   ;;  %106 = vperm.xlu0 %2143, %v2247_v14  }
  0x1e   :  { %121 = vperm.xlu1 %2144, %v2254_v15   ;;  %116 = vperm.xlu0 %2143, %v2259_v16  }
  0x22   :  { %131 = vperm.xlu1 %2144, %v2266_v17   ;;  %126 = vperm.xlu0 %2143, %v2271_v18  }
  0x26   :  { %141 = vperm.xlu1 %2144, %v2278_v19   ;;  %136 = vperm.xlu0 %2143, %v2283_v20  }
  0x2a   :  { %151 = vperm.xlu1 %2144, %v2290_v21   ;;  %146 = vperm.xlu0 %2143, %v2295_v22  }
  0x2e   :  { %161 = vperm.xlu1 %2144, %v2302_v23   ;;  %156 = vperm.xlu0 %2143, %v2307_v24  }
  0x32   :  { %171 = vperm.xlu1 %2144, %v2314_v25   ;;  %166 = vperm.xlu0 %2143, %v2319_v26  }
  0x36   :  { %181 = vperm.xlu1 %2144, %v2326_v27   ;;  %176 = vperm.xlu0 %2143, %v2331_v28  }
  0x3a   :  { %191 = vperm.xlu1 %2144, %v2338_v29   ;;  %186 = vperm.xlu0 %2143, %v2343_v30  }
  0x3e   :  { %201 = vperm.xlu1 %2144, %v2350_v31   ;;  %196 = vperm.xlu0 %2143, %v2355_v32  }
  0x42   :  { %2146 = vset.pattern.permute.xlu1 %v2150_v33  ;;  %2145 = vset.pattern.permute.xlu0 %v2150_v33 }
  0x43   :  { %245 = vperm.xlu1 %2146, %v2187_v4   ;;  %241 = vperm.xlu0 %2145, %v2175_v2  }
  0x47   :  { %249 = vperm.xlu1 %2146, %v2170_v1   ;;  %253 = vperm.xlu0 %2145, %v2182_v3  }
  0x4b   :  { %257 = vperm.xlu1 %2146, %v2199_v6   ;;  %261 = vperm.xlu0 %2145, %v2194_v5  }
  0x4f   :  { %265 = vperm.xlu1 %2146, %v2211_v8   ;;  %269 = vperm.xlu0 %2145, %v2206_v7  }
  0x53   :  { %273 = vperm.xlu1 %2146, %v2223_v10   ;;  %277 = vperm.xlu0 %2145, %v2218_v9  }
  0x57   :  { %281 = vperm.xlu1 %2146, %v2235_v12   ;;  %285 = vperm.xlu0 %2145, %v2230_v11  }
  0x5b   :  { %289 = vperm.xlu1 %2146, %v2247_v14   ;;  %293 = vperm.xlu0 %2145, %v2242_v13  }
  0x5f   :  { %297 = vperm.xlu1 %2146, %v2259_v16   ;;  %301 = vperm.xlu0 %2145, %v2254_v15  }
  0x63   :  { %305 = vperm.xlu1 %2146, %v2271_v18   ;;  %309 = vperm.xlu0 %2145, %v2266_v17  }
  0x67   :  { %313 = vperm.xlu1 %2146, %v2283_v20   ;;  %317 = vperm.xlu0 %2145, %v2278_v19  }
  0x6b   :  { %321 = vperm.xlu1 %2146, %v2295_v22   ;;  %325 = vperm.xlu0 %2145, %v2290_v21  }
  0x6f   :  { %329 = vperm.xlu1 %2146, %v2307_v24   ;;  %333 = vperm.xlu0 %2145, %v2302_v23  }
  0x73   :  { %337 = vperm.xlu1 %2146, %v2319_v26   ;;  %341 = vperm.xlu0 %2145, %v2314_v25  }
  0x77   :  { %345 = vperm.xlu1 %2146, %v2331_v28   ;;  %349 = vperm.xlu0 %2145, %v2326_v27  }
  0x7b   :  { %353 = vperm.xlu1 %2146, %v2343_v30   ;;  %357 = vperm.xlu0 %2145, %v2338_v29  }
  0x7d   :  { %v2389_v35 = vpop.permute.xlu1 %56  ;;  %v2391_v36 = vpop.permute.xlu0 %46 }
  0x7f   :  { %361 = vperm.xlu1 %2146, %v2355_v32   ;;  %365 = vperm.xlu0 %2145, %v2350_v31  }
  0x81   :  { %v2397_v38 = vpop.permute.xlu1 %61  ;;  %v2399_v39 = vpop.permute.xlu0 %51 }
  0x83   :  { %2147 = vset.pattern.permute.xlu1 %v2151_v40  ;;  %2148 = vset.pattern.permute.xlu0 %v2151_v40 }
  0x84   :  { %437 = vperm.xlu1 %2147, %v2175_v2   ;;  %441 = vperm.xlu0 %2148, %v2187_v4  }
  0x85   :  { %v2409_v43 = vpop.permute.xlu1 %71  ;;  %v2411_v44 = vpop.permute.xlu0 %66 }
  0x88   :  { %445 = vperm.xlu1 %2147, %v2170_v1   ;;  %453 = vperm.xlu0 %2148, %v2199_v6  }
  0x89   :  { %v82_v46 = vpop.permute.xlu1 %81  ;;  %v2418_v47 = vpop.permute.xlu0 %76 }
  0x8a   :  { %v2421_v48 = vmul.f32 %v2414_v45, %v82_v46 }
  0x8c   :  { %449 = vperm.xlu1 %2147, %v2182_v3   ;;  %461 = vperm.xlu0 %2148, %v2211_v8  }
  0x8d   :  { %v92_v49 = vpop.permute.xlu1 %91  ;;  %v87_v50 = vpop.permute.xlu0 %86 }
  0x8e   :  { %v2426_v51 = vmul.f32 %v2414_v45, %v92_v49  ;;  %v2429_v52 = vmul.f32 %v2414_v45, %v87_v50 }
  0x90   :  { %457 = vperm.xlu1 %2147, %v2194_v5   ;;  %469 = vperm.xlu0 %2148, %v2223_v10  }
  0x91   :  { %v102_v53 = vpop.permute.xlu1 %101  ;;  %v97_v54 = vpop.permute.xlu0 %96 }
  0x92   :  { %v2434_v55 = vmul.f32 %v2414_v45, %v102_v53  ;;  %v2437_v56 = vmul.f32 %v2414_v45, %v97_v54 }
  0x94   :  { %465 = vperm.xlu1 %2147, %v2206_v7   ;;  %477 = vperm.xlu0 %2148, %v2235_v12  }
  0x95   :  { %v112_v57 = vpop.permute.xlu1 %111  ;;  %v107_v58 = vpop.permute.xlu0 %106 }
  0x96   :  { %v2442_v59 = vmul.f32 %v2414_v45, %v112_v57  ;;  %v2445_v60 = vmul.f32 %v2414_v45, %v107_v58  ;;  %v210_v58 = vmul.f32 %v2414_v45, %v2389_v35  ;;  %v212_v35 = vmul.f32 %v2414_v45, %v2411_v44 }
  0x98   :  { %473 = vperm.xlu1 %2147, %v2218_v9   ;;  %485 = vperm.xlu0 %2148, %v2247_v14  }
  0x99   :  { %v122_v61 = vpop.permute.xlu1 %121  ;;  %v117_v62 = vpop.permute.xlu0 %116 }
  0x9a   :  { %v2450_v63 = vmul.f32 %v2414_v45, %v122_v61  ;;  %v2453_v0 = vmul.f32 %v2414_v45, %v117_v62 }
  0x9c   :  { %481 = vperm.xlu1 %2147, %v2230_v11   ;;  %493 = vperm.xlu0 %2148, %v2259_v16  }
  0x9d   :  { %v132_v1 = vpop.permute.xlu1 %131  ;;  %v127_v2 = vpop.permute.xlu0 %126 }
  0x9e   :  { %v2458_v3 = vmul.f32 %v2414_v45, %v132_v1  ;;  %v2461_v4 = vmul.f32 %v2414_v45, %v127_v2 }
  0xa0   :  { %489 = vperm.xlu1 %2147, %v2242_v13   ;;  %501 = vperm.xlu0 %2148, %v2271_v18  }
  0xa1   :  { %v142_v5 = vpop.permute.xlu1 %141  ;;  %v137_v6 = vpop.permute.xlu0 %136 }
  0xa2   :  { %v2466_v7 = vmul.f32 %v2414_v45, %v142_v5  ;;  %v2469_v8 = vmul.f32 %v2414_v45, %v137_v6  ;;  %v213_v5 = vmul.f32 %v2414_v45, %v2409_v43 }
  0xa4   :  { %497 = vperm.xlu1 %2147, %v2254_v15   ;;  %509 = vperm.xlu0 %2148, %v2283_v20  }
  0xa5   :  { %v152_v9 = vpop.permute.xlu1 %151  ;;  %v147_v10 = vpop.permute.xlu0 %146 }
  0xa6   :  { %v2474_v11 = vmul.f32 %v2414_v45, %v152_v9  ;;  %v2477_v12 = vmul.f32 %v2414_v45, %v147_v10 }
  0xa8   :  { %505 = vperm.xlu1 %2147, %v2266_v17   ;;  %517 = vperm.xlu0 %2148, %v2295_v22  }
  0xa9   :  { %v162_v13 = vpop.permute.xlu1 %161  ;;  %v157_v14 = vpop.permute.xlu0 %156 }
  0xaa   :  { %v2482_v16 = vmul.f32 %v2414_v45, %v162_v13  ;;  %v2485_v15 = vmul.f32 %v2414_v45, %v157_v14  ;;  %v214_v14 = vmul.f32 %v2414_v45, %v2418_v47 }
  0xac   :  { %513 = vperm.xlu1 %2147, %v2278_v19   ;;  %525 = vperm.xlu0 %2148, %v2307_v24  }
  0xad   :  { %v172_v18 = vpop.permute.xlu1 %171  ;;  %v167_v20 = vpop.permute.xlu0 %166 }
  0xae   :  { %v2490_v33 = vmul.f32 %v2414_v45, %v172_v18  ;;  %v2493_v17 = vmul.f32 %v2414_v45, %v167_v20 }
  0xb0   :  { %521 = vperm.xlu1 %2147, %v2290_v21   ;;  %533 = vperm.xlu0 %2148, %v2319_v26  }
  0xb1   :  { %v182_v22 = vpop.permute.xlu1 %181  ;;  %v177_v34 = vpop.permute.xlu0 %176 }
  0xb2   :  { %v2498_v40 = vmul.f32 %v2414_v45, %v182_v22  ;;  %v2501_v19 = vmul.f32 %v2414_v45, %v177_v34 }
  0xb4   :  { %529 = vperm.xlu1 %2147, %v2302_v23   ;;  %541 = vperm.xlu0 %2148, %v2331_v28   ;;  %v370_v28 = vsub.s32 1, %v2395_v37 }
  0xb5   :  { %v192_v24 = vpop.permute.xlu1 %191  ;;  %v187_v41 = vpop.permute.xlu0 %186 }
  0xb6   :  { %v2506_v46 = vmul.f32 %v2414_v45, %v192_v24  ;;  %v2509_v21 = vmul.f32 %v2414_v45, %v187_v41 }
  0xb8   :  { %537 = vperm.xlu1 %2147, %v2314_v25   ;;  %549 = vperm.xlu0 %2148, %v2343_v30   ;;  %v2528_v25 = vrot.slane %v2407_v42, %v370_v28 }
  0xb9   :  { %v202_v26 = vpop.permute.xlu1 %201  ;;  %v197_v49 = vpop.permute.xlu0 %196 }
  0xba   :  { %v2514_v50 = vmul.f32 %v2414_v45, %v202_v26  ;;  %v2517_v23 = vmul.f32 %v2414_v45, %v197_v49 }
  0xbc   :  { %545 = vperm.xlu1 %2147, %v2326_v27   ;;  %557 = vperm.xlu0 %2148, %v2355_v32   ;;  %v211_v27 = vmul.f32 %v2414_v45, %v2397_v38 }
  0xbe   :  { %v2522_v53 = vpop.permute.xlu1 %245  ;;  %v2524_v54 = vpop.permute.xlu0 %241 }
  0xc0   :  { %553 = vperm.xlu1 %2147, %v2338_v29  }
  0xc2   :  { %v250_v30 = vpop.permute.xlu1 %249  ;;  %v254_v57 = vpop.permute.xlu0 %253 }
  0xc3   :  { %v374_v32 = vmul.f32 %v2528_v25, %v250_v30  ;;  %v375_v61 = vmul.f32 %v2528_v25, %v254_v57 }
  0xc4   :  { %561 = vperm.xlu1 %2147, %v2350_v31  }
  0xc5   :  { %v2537_v62 = vadd.f32 %v374_v32, %v210_v58  ;;  %v2539_v29 = vadd.f32 %v375_v61, %v211_v27 }
  0xc6   :  { %v258_v1 = vpop.permute.xlu1 %257  ;;  %v262_v2 = vpop.permute.xlu0 %261 }
  0xc7   :  { %v376_v38 = vmul.f32 %v2528_v25, %v258_v1  ;;  %v377_v6 = vmul.f32 %v2528_v25, %v262_v2 }
  0xc9   :  { %v2547_v9 = vadd.f32 %v376_v38, %v212_v35  ;;  %v2549_v10 = vadd.f32 %v377_v6, %v213_v5 }
  0xca   :  { %v266_v31 = vpop.permute.xlu1 %265  ;;  %v270_v13 = vpop.permute.xlu0 %269 }
  0xcb   :  { %v378_v18 = vmul.f32 %v2528_v25, %v266_v31  ;;  %v379_v43 = vmul.f32 %v2528_v25, %v270_v13 }
  0xcd   :  { %v2555_v20 = vadd.f32 %v378_v18, %v214_v14  ;;  %v2558_v44 = vadd.f32 %v379_v43, %v2421_v48 }
  0xce   :  { %v274_v22 = vpop.permute.xlu1 %273  ;;  %v278_v34 = vpop.permute.xlu0 %277 }
  0xcf   :  { %v380_v24 = vmul.f32 %v2528_v25, %v274_v22  ;;  %v381_v41 = vmul.f32 %v2528_v25, %v278_v34 }
  0xd1   :  { %v2563_v26 = vadd.f32 %v380_v24, %v2429_v52  ;;  %v2566_v47 = vadd.f32 %v381_v41, %v2426_v51 }
  0xd2   :  { %v282_v49 = vpop.permute.xlu1 %281  ;;  %v286_v28 = vpop.permute.xlu0 %285 }
  0xd3   :  { %v382_v30 = vmul.f32 %v2528_v25, %v282_v49  ;;  %v383_v57 = vmul.f32 %v2528_v25, %v286_v28 }
  0xd5   :  { %v2571_v48 = vadd.f32 %v382_v30, %v2437_v56  ;;  %v2574_v58 = vadd.f32 %v383_v57, %v2434_v55 }
  0xd6   :  { %v290_v27 = vpop.permute.xlu1 %289  ;;  %v294_v32 = vpop.permute.xlu0 %293 }
  0xd7   :  { %v384_v52 = vmul.f32 %v2528_v25, %v290_v27  ;;  %v385_v61 = vmul.f32 %v2528_v25, %v294_v32 }
  0xd9   :  { %v2579_v51 = vadd.f32 %v384_v52, %v2445_v60  ;;  %v2582_v1 = vadd.f32 %v385_v61, %v2442_v59 }
  0xda   :  { %v298_v2 = vpop.permute.xlu1 %297  ;;  %v302_v5 = vpop.permute.xlu0 %301 }
  0xdb   :  { %v386_v56 = vmul.f32 %v2528_v25, %v298_v2  ;;  %v387_v35 = vmul.f32 %v2528_v25, %v302_v5 }
  0xdd   :  { %v2587_v55 = vadd.f32 %v386_v56, %v2453_v0  ;;  %v2590_v38 = vadd.f32 %v387_v35, %v2450_v63 }
  0xde   :  { %v306_v6 = vpop.permute.xlu1 %305  ;;  %v310_v31 = vpop.permute.xlu0 %309 }
  0xdf   :  { %v388_v60 = vmul.f32 %v2528_v25, %v306_v6  ;;  %v389_v13 = vmul.f32 %v2528_v25, %v310_v31 }
  0xe1   :  { %v2595_v59 = vadd.f32 %v388_v60, %v2461_v4  ;;  %v2598_v14 = vadd.f32 %v389_v13, %v2458_v3 }
  0xe2   :  { %v314_v18 = vpop.permute.xlu1 %313  ;;  %v318_v43 = vpop.permute.xlu0 %317 }
  0xe3   :  { %v390_v0 = vmul.f32 %v2528_v25, %v314_v18  ;;  %v391_v22 = vmul.f32 %v2528_v25, %v318_v43 }
  0xe5   :  { %v2603_v63 = vadd.f32 %v390_v0, %v2469_v8  ;;  %v2606_v34 = vadd.f32 %v391_v22, %v2466_v7 }
  0xe6   :  { %v322_v24 = vpop.permute.xlu1 %321  ;;  %v326_v41 = vpop.permute.xlu0 %325 }
  0xe7   :  { %v392_v4 = vmul.f32 %v2528_v25, %v322_v24  ;;  %v393_v49 = vmul.f32 %v2528_v25, %v326_v41  ;;  %v373_v41 = vmul.f32 %v2528_v25, %v2522_v53 }
  0xe9   :  { %v2611_v3 = vadd.f32 %v392_v4, %v2477_v12  ;;  %v2614_v28 = vadd.f32 %v393_v49, %v2474_v11  ;;  %v372_v4 = vmul.f32 %v2528_v25, %v2524_v54  ;;  %v208_v49 = vmul.f32 %v2414_v45, %v2391_v36 }
  0xea   :  { %v330_v30 = vpop.permute.xlu1 %329  ;;  %v334_v57 = vpop.permute.xlu0 %333 }
  0xeb   :  { %v394_v8 = vmul.f32 %v2528_v25, %v330_v30  ;;  %v395_v27 = vmul.f32 %v2528_v25, %v334_v57  ;;  %v209_v30 = vmul.f32 %v2414_v45, %v2399_v39 }
  0xed   :  { %v2619_v7 = vadd.f32 %v394_v8, %v2485_v15  ;;  %v2622_v32 = vadd.f32 %v395_v27, %v2482_v16  ;;  %v405_v8 = vadd.f32 %v373_v41, %v209_v30  ;;  %v404_v27 = vadd.f32 %v372_v4, %v208_v49 }
  0xee   :  { %v338_v52 = vpop.permute.xlu1 %337  ;;  %v342_v61 = vpop.permute.xlu0 %341 }
  0xef   :  { %v396_v12 = vmul.f32 %v2528_v25, %v338_v52  ;;  %v397_v2 = vmul.f32 %v2528_v25, %v342_v61 }
  0xf1   :  { %v2627_v11 = vadd.f32 %v396_v12, %v2493_v17  ;;  %v2630_v5 = vadd.f32 %v397_v2, %v2490_v33  ;;  %v566_v33 = vsub.s32 2, %v2395_v37 }
  0xf2   :  { %v346_v56 = vpop.permute.xlu1 %345  ;;  %v350_v35 = vpop.permute.xlu0 %349 }
  0xf3   :  { %v398_v15 = vmul.f32 %v2528_v25, %v346_v56  ;;  %v399_v6 = vmul.f32 %v2528_v25, %v350_v35  ;;  %v2656_v37 = vrot.slane %v2407_v42, %v566_v33 }
  0xf5   :  { %v2635_v16 = vadd.f32 %v398_v15, %v2501_v19  ;;  %v2638_v31 = vadd.f32 %v399_v6, %v2498_v40 }
  0xf6   :  { %v354_v60 = vpop.permute.xlu1 %353  ;;  %v358_v13 = vpop.permute.xlu0 %357 }
  0xf7   :  { %v400_v17 = vmul.f32 %v2528_v25, %v354_v60  ;;  %v401_v18 = vmul.f32 %v2528_v25, %v358_v13 }
  0xf9   :  { %v2644_v43 = vadd.f32 %v400_v17, %v2509_v21  ;;  %v2647_v0 = vadd.f32 %v401_v18, %v2506_v46 }
  0xfa   :  { %v362_v22 = vpop.permute.xlu1 %361  ;;  %v366_v19 = vpop.permute.xlu0 %365 }
  0xfb   :  { %3811 = vst [vmem:[#allocation2_spill] sm:$0xff] %v2647_v0  ;;  %v402_v24 = vmul.f32 %v2528_v25, %v362_v22  ;;  %v403_v40 = vmul.f32 %v2528_v25, %v366_v19 }
  0xfd   :  { %v2659_v21 = vadd.f32 %v402_v24, %v2517_v23  ;;  %v2662_v46 = vadd.f32 %v403_v40, %v2514_v50 }
  0xff   :  { %3812 = vst [vmem:[#allocation3_spill] sm:$0xff] %v2659_v21  ;;  %3813 = vst [vmem:[#allocation4_spill] sm:$0xff] %v2662_v46  ;;  %v438_v57 = vpop.permute.xlu1 %437  ;;  %v442_v53 = vpop.permute.xlu0 %441 }
 0x100   :  { %v568_v54 = vmul.f32 %v2656_v37, %v438_v57  ;;  %v569_v42 = vmul.f32 %v2656_v37, %v442_v53 }
 0x102   :  { %v600_v25 = vadd.f32 %v568_v54, %v404_v27  ;;  %v601_v23 = vadd.f32 %v569_v42, %v405_v8 }
 0x103   :  { %v446_v52 = vpop.permute.xlu1 %445  ;;  %v454_v61 = vpop.permute.xlu0 %453 }
 0x104   :  { %v632_v50 = vmul.f32 0.63661975, %v600_v25  ;;  %v633_v12 = vmul.f32 0.63661975, %v601_v23  ;;  %v570_v2 = vmul.f32 %v2656_v37, %v446_v52  ;;  %v572_v36 = vmul.f32 %v2656_v37, %v454_v61 }
 0x106   :  { %v664_v56 = vadd.f32 0.5, %v632_v50  ;;  %v665_v39 = vadd.f32 0.5, %v633_v12  ;;  %v2673_v45 = vadd.f32 %v570_v2, %v2537_v62  ;;  %v2676_v35 = vadd.f32 %v572_v36, %v2547_v9 }
 0x107   :  { %v450_v60 = vpop.permute.xlu1 %449  ;;  %v462_v13 = vpop.permute.xlu0 %461 }
 0x108   :  { %v696_v15 = vfloor.f32 %v664_v56  ;;  %v697_v6 = vfloor.f32 %v665_v39  ;;  %v634_v33 = vmul.f32 0.63661975, %v2673_v45  ;;  %v636_v22 = vmul.f32 0.63661975, %v2676_v35 }
 0x109   :  { %v571_v40 = vmul.f32 %v2656_v37, %v450_v60  ;;  %v574_v62 = vmul.f32 %v2656_v37, %v462_v13 }
 0x10a   :  { %v728_v17 = vmul.f32 1.5703125, %v696_v15  ;;  %v2076_v18 = vtrunc.f32 %v696_v15  ;;  %v729_v19 = vmul.f32 1.5703125, %v697_v6  ;;  %v2078_v24 = vtrunc.f32 %v697_v6 }
 0x10b   :  { %v792_v4 = vmul.f32 0.0004837513, %v696_v15  ;;  %v856_v49 = vmul.f32 7.54979e-08, %v696_v15  ;;  %v793_v57 = vmul.f32 0.0004837513, %v697_v6  ;;  %v666_v54 = vadd.f32 0.5, %v634_v33 }
 0x10c   :  { %v760_v41 = vsub.f32 %v600_v25, %v728_v17  ;;  %v2077_v9 = vcvt.f32.s32 %v2076_v18  ;;  %v761_v30 = vsub.f32 %v601_v23, %v729_v19  ;;  %v2079_v53 = vcvt.f32.s32 %v2078_v24 }
 0x10d   :  { %v668_v42 = vadd.f32 0.5, %v636_v22  ;;  %v857_v61 = vmul.f32 7.54979e-08, %v697_v6  ;;  %v2683_v50 = vadd.f32 %v571_v40, %v2539_v29  ;;  %v2686_v12 = vadd.f32 %v574_v62, %v2555_v20 }
 0x10e   :  { %v824_v8 = vsub.f32 %v760_v41, %v792_v4  ;;  %v1496_v27 = vand.u32 3, %v2077_v9  ;;  %v825_v52 = vsub.f32 %v761_v30, %v793_v57  ;;  %v1497_v25 = vand.u32 3, %v2079_v53 }
 0x10f   :  { %v698_v39 = vfloor.f32 %v666_v54  ;;  %v2694_v15 = vfloor.f32 %v668_v42  ;;  %v2699_v6 = vmul.f32 0.63661975, %v2683_v50  ;;  %v2702_v20 = vmul.f32 0.63661975, %v2686_v12 }
 0x110   :  { %v2688_v2 = vsub.f32 %v824_v8, %v856_v49  ;;  %v2690_v36 = vsub.f32 %v825_v52, %v857_v61  ;;  %v1784_v56 = vadd.s32 1, %v1496_v27  ;;  %v1528_v60 = vand.u32 1, %v1496_v27 }
 0x111   :  { %v1656_v18 = vand.u32 2, %v1496_v27  ;;  %v1529_v33 = vand.u32 1, %v1497_v25  ;;  %v1657_v24 = vand.u32 2, %v1497_v25  ;;  %v1785_v40 = vadd.s32 1, %v1497_v25 }
 0x112   :  { %v920_v23 = vmul.f32 %v2688_v2, %v2688_v2  ;;  %v921_v29 = vmul.f32 %v2690_v36, %v2690_v36  ;;  %v1816_v4 = vand.u32 2, %v1784_v56  ;;  %v730_v9 = vmul.f32 1.5703125, %v698_v39 }
 0x113   :  { %v794_v57 = vmul.f32 0.0004837513, %v698_v39  ;;  %v2080_v53 = vtrunc.f32 %v698_v39  ;;  %v732_v52 = vmul.f32 1.5703125, %v2694_v15  ;;  %v1817_v46 = vand.u32 2, %v1785_v40 }
 0x114   :  { %v952_v13 = vmul.f32 -0.00019515296, %v920_v23  ;;  %v1176_v17 = vmul.f32 2.4433157e-05, %v920_v23  ;;  %v953_v22 = vmul.f32 -0.00019515296, %v921_v29  ;;  %v762_v42 = vsub.f32 %v2673_v45, %v730_v9 }
 0x115   :  { %v1177_v19 = vmul.f32 2.4433157e-05, %v921_v29  ;;  %v2081_v0 = vcvt.f32.s32 %v2080_v53  ;;  %vm2706_vm0 = vcmp.ne.s32.totalorder %v1528_v60, 0  ;;  %v764_v45 = vsub.f32 %v2676_v35, %v732_v52 }
 0x116   :  { %v984_v62 = vadd.f32 0.008332161, %v952_v13  ;;  %v2044_v41 = vadd.f32 -0.0013887316, %v1176_v17  ;;  %v985_v49 = vadd.f32 0.008332161, %v953_v22  ;;  %v826_v13 = vsub.f32 %v762_v42, %v794_v57 }
 0x117   :  { %v2045_v30 = vadd.f32 -0.0013887316, %v1177_v19  ;;  %v858_v17 = vmul.f32 7.54979e-08, %v698_v39  ;;  %vm2713_vm1 = vcmp.ne.s32.totalorder %v1529_v33, 0  ;;  %v1369_v57 = vmul.f32 0.5, %v921_v29 }
 0x118   :  { %v1016_v8 = vmul.f32 %v984_v62, %v920_v23  ;;  %v1240_v54 = vmul.f32 %v2044_v41, %v920_v23  ;;  %v1017_v27 = vmul.f32 %v985_v49, %v921_v29  ;;  %v2710_v62 = vand.u32 3, %v2081_v0 }
 0x119   :  { %v1241_v61 = vmul.f32 %v2045_v30, %v921_v29  ;;  %v1368_v49 = vmul.f32 0.5, %v920_v23  ;;  %v2717_v30 = vsub.f32 %v826_v13, %v858_v17  ;;  %v796_v53 = vmul.f32 0.0004837513, %v2694_v15 }
 0x11a   :  { %v2012_v21 = vadd.f32 -0.16666655, %v1016_v8  ;;  %v1272_v25 = vadd.f32 0.041666646, %v1240_v54  ;;  %v2013_v22 = vadd.f32 -0.16666655, %v1017_v27 }
 0x11b   :  { %v1273_v19 = vadd.f32 0.041666646, %v1241_v61  ;;  %vm2721_vm2 = vcmp.ne.s32.totalorder %v1656_v18, 0  ;;  %vm2725_vm3 = vcmp.ne.s32.totalorder %v1816_v4, 0  ;;  %v922_v35 = vmul.f32 %v2717_v30, %v2717_v30 }
 0x11c   :  { %v1080_v41 = vmul.f32 %v2012_v21, %v920_v23  ;;  %v1304_v9 = vmul.f32 %v1272_v25, %v920_v23  ;;  %v1081_v39 = vmul.f32 %v2013_v22, %v921_v29  ;;  %v1786_v33 = vadd.s32 1, %v2710_v62 }
 0x11d   :  { %v1305_v60 = vmul.f32 %v1273_v19, %v921_v29  ;;  %vm2733_vm4 = vcmp.ne.s32.totalorder %v1657_v24, 0  ;;  %vm2737_vm5 = vcmp.ne.s32.totalorder %v1817_v46, 0  ;;  %v828_v18 = vsub.f32 %v764_v45, %v796_v53 }
 0x11e   :  { %v1112_v8 = vmul.f32 %v1080_v41, %v2688_v2  ;;  %v1336_v0 = vmul.f32 %v1304_v9, %v920_v23  ;;  %v1113_v42 = vmul.f32 %v1081_v39, %v2690_v36  ;;  %v2084_v4 = vtrunc.f32 %v2694_v15  ;;  %v458_v23 = vpop.permute.xlu1 %457 }
 0x11f   :  { %v1337_v52 = vmul.f32 %v1305_v60, %v921_v29  ;;  %v954_v25 = vmul.f32 -0.00019515296, %v922_v35  ;;  %v1178_v13 = vmul.f32 2.4433157e-05, %v922_v35  ;;  %v1530_v17 = vand.u32 1, %v2710_v62 }
 0x120   :  { %v1400_v61 = vsub.f32 %v1336_v0, %v1368_v49  ;;  %v1144_v22 = vadd.f32 %v1112_v8, %v2688_v2  ;;  %v1145_v29 = vadd.f32 %v1113_v42, %v2690_v36  ;;  %v1658_v19 = vand.u32 2, %v2710_v62 }
 0x121   :  { %v1401_v24 = vsub.f32 %v1337_v52, %v1369_v57  ;;  %v986_v46 = vadd.f32 0.008332161, %v954_v25  ;;  %v2046_v9 = vadd.f32 -0.0013887316, %v1178_v13  ;;  %v1818_v39 = vand.u32 2, %v1786_v33 }
 0x122   :  { %v1432_v41 = vadd.f32 1.0, %v1400_v61  ;;  %v860_v45 = vmul.f32 7.54979e-08, %v2694_v15  ;;  %v2085_v53 = vcvt.f32.s32 %v2084_v4  ;;  %v667_v49 = vadd.f32 0.5, %v2699_v6 }
 0x123   :  { %v1433_v60 = vadd.f32 1.0, %v1401_v24  ;;  %v1018_v36 = vmul.f32 %v986_v46, %v922_v35  ;;  %v1242_v57 = vmul.f32 %v2046_v9, %v922_v35  ;;  %v1370_v24 = vmul.f32 0.5, %v922_v35 }
 0x124   :  { %v1592_v0 = vsel %vm2706_vm0, %v1432_v41, %v1144_v22  ;;  %v1624_v2 = vsel %vm2706_vm0, %v1144_v22, %v1432_v41  ;;  %v2760_v25 = vsub.f32 %v828_v18, %v860_v45  ;;  %v1500_v13 = vand.u32 3, %v2085_v53 }
 0x125   :  { %v1720_v8 = vsub.f32 0.0, %v1592_v0  ;;  %v1880_v62 = vsub.f32 0.0, %v1624_v2  ;;  %v1593_v42 = vsel %vm2713_vm1, %v1433_v60, %v1145_v29  ;;  %v1625_v33 = vsel %vm2713_vm1, %v1145_v29, %v1433_v60 }
 0x126   :  { %v1721_v15 = vsub.f32 0.0, %v1593_v42  ;;  %v1881_v52 = vsub.f32 0.0, %v1625_v33  ;;  %v2014_v4 = vadd.f32 -0.16666655, %v1018_v36  ;;  %v1274_v6 = vadd.f32 0.041666646, %v1242_v57 }
 0x127   :  { %v1752_v61 = vsel %vm2721_vm2, %v1720_v8, %v1592_v0  ;;  %v1912_v56 = vsel %vm2725_vm3, %v1880_v62, %v1624_v2  ;;  %v924_v18 = vmul.f32 %v2760_v25, %v2760_v25  ;;  %v699_v41 = vfloor.f32 %v667_v49 }
 0x128   :  { %1944 = vst [vmem:[%s3810_s2] sm:$0xff] %v1752_v61  ;;  %1976 = vst [vmem:[%s3810_s2 + $0x8] sm:$0xff] %v1912_v56  ;;  %v1753_v40 = vsel %vm2733_vm4, %v1721_v15, %v1593_v42  ;;  %v1913_v54 = vsel %vm2737_vm5, %v1881_v52, %v1625_v33  ;;  %v1082_v22 = vmul.f32 %v2014_v4, %v922_v35  ;;  %vm2781_vm6 = vcmp.ne.s32.totalorder %v1530_v17, 0 }
 0x129   :  { %v1306_v21 = vmul.f32 %v1274_v6, %v922_v35  ;;  %1945 = vst [vmem:[%s3810_s2 + $0x10] sm:$0xff] %v1753_v40  ;;  %1977 = vst [vmem:[%s3810_s2 + $0x18] sm:$0xff] %v1913_v54  ;;  %v956_v46 = vmul.f32 -0.00019515296, %v924_v18  ;;  %v1180_v9 = vmul.f32 2.4433157e-05, %v924_v18  ;;  %v2082_v42 = vtrunc.f32 %v699_v41 }
 0x12a   :  { %v1114_v29 = vmul.f32 %v1082_v22, %v2717_v30  ;;  %v670_v60 = vadd.f32 0.5, %v2702_v20  ;;  %vm2786_vm7 = vcmp.ne.s32.totalorder %v1658_v19, 0  ;;  %vm2790_vm8 = vcmp.ne.s32.totalorder %v1818_v39, 0 }
 0x12b   :  { %v1338_v27 = vmul.f32 %v1306_v21, %v922_v35  ;;  %v1532_v2 = vand.u32 1, %v1500_v13  ;;  %v988_v35 = vadd.f32 0.008332161, %v956_v46  ;;  %v2048_v49 = vadd.f32 -0.0013887316, %v1180_v9 }
 0x12c   :  { %v1660_v17 = vand.u32 2, %v1500_v13  ;;  %v731_v36 = vmul.f32 1.5703125, %v699_v41  ;;  %v1146_v57 = vadd.f32 %v1114_v29, %v2717_v30  ;;  %v1788_v62 = vadd.s32 1, %v1500_v13 }
 0x12d   :  { %v1402_v45 = vsub.f32 %v1338_v27, %v1370_v24  ;;  %v1020_v20 = vmul.f32 %v988_v35, %v924_v18  ;;  %v1244_v33 = vmul.f32 %v2048_v49, %v924_v18  ;;  %v702_v15 = vfloor.f32 %v670_v60 }
 0x12e   :  { %v763_v19 = vsub.f32 %v2683_v50, %v731_v36  ;;  %v795_v4 = vmul.f32 0.0004837513, %v699_v41  ;;  %v2083_v6 = vcvt.f32.s32 %v2082_v42  ;;  %v1820_v54 = vand.u32 2, %v1788_v62 }
 0x12f   :  { %v1434_v8 = vadd.f32 1.0, %v1402_v45  ;;  %v2016_v40 = vadd.f32 -0.16666655, %v1020_v20  ;;  %v1276_v30 = vadd.f32 0.041666646, %v1244_v33  ;;  %v734_v21 = vmul.f32 1.5703125, %v702_v15 }
 0x130   :  { %v827_v13 = vsub.f32 %v763_v19, %v795_v4  ;;  %v859_v22 = vmul.f32 7.54979e-08, %v699_v41  ;;  %v1372_v46 = vmul.f32 0.5, %v924_v18  ;;  %vm2810_vm9 = vcmp.ne.s32.totalorder %v1532_v2, 0 }
 0x131   :  { %v1594_v39 = vsel %vm2781_vm6, %v1434_v8, %v1146_v57  ;;  %v1626_v52 = vsel %vm2781_vm6, %v1146_v57, %v1434_v8  ;;  %v1084_v27 = vmul.f32 %v2016_v40, %v924_v18  ;;  %v1308_v24 = vmul.f32 %v1276_v30, %v924_v18  ;;  %v470_v30 = vpop.permute.xlu0 %469 }
 0x132   :  { %v1722_v61 = vsub.f32 0.0, %v1594_v39  ;;  %v1882_v56 = vsub.f32 0.0, %v1626_v52  ;;  %v2814_v9 = vsub.f32 %v827_v13, %v859_v22  ;;  %v1499_v60 = vand.u32 3, %v2083_v6 }
 0x133   :  { %v1116_v45 = vmul.f32 %v1084_v27, %v2760_v25  ;;  %v1340_v53 = vmul.f32 %v1308_v24, %v924_v18  ;;  %v766_v0 = vsub.f32 %v2686_v12, %v734_v21  ;;  %v798_v35 = vmul.f32 0.0004837513, %v702_v15  ;;  %v466_v27 = vpop.permute.xlu1 %465 }
 0x134   :  { %v1754_v50 = vsel %vm2786_vm7, %v1722_v61, %v1594_v39  ;;  %v1914_v29 = vsel %vm2790_vm8, %v1882_v56, %v1626_v52  ;;  %vm2818_vm10 = vcmp.ne.s32.totalorder %v1660_v17, 0  ;;  %vm2822_vm11 = vcmp.ne.s32.totalorder %v1820_v54, 0 }
 0x135   :  { %1946 = vst [vmem:[%s3810_s2 + $0x20] sm:$0xff] %v1754_v50  ;;  %1978 = vst [vmem:[%s3810_s2 + $0x28] sm:$0xff] %v1914_v29  ;;  %v923_v2 = vmul.f32 %v2814_v9, %v2814_v9  ;;  %v573_v57 = vmul.f32 %v2656_v37, %v458_v23  ;;  %v1404_v8 = vsub.f32 %v1340_v53, %v1372_v46  ;;  %v862_v42 = vmul.f32 7.54979e-08, %v702_v15 }
 0x136   :  { %v830_v62 = vsub.f32 %v766_v0, %v798_v35  ;;  %v2088_v18 = vtrunc.f32 %v702_v15  ;;  %v1531_v33 = vand.u32 1, %v1499_v60  ;;  %v1787_v17 = vadd.s32 1, %v1499_v60 }
 0x137   :  { %v955_v20 = vmul.f32 -0.00019515296, %v923_v2  ;;  %v1179_v12 = vmul.f32 2.4433157e-05, %v923_v2  ;;  %v1148_v19 = vadd.f32 %v1116_v45, %v2760_v25  ;;  %v1436_v39 = vadd.f32 1.0, %v1404_v8 }
 0x138   :  { %v2830_v52 = vsub.f32 %v830_v62, %v862_v42  ;;  %v2089_v4 = vcvt.f32.s32 %v2088_v18  ;;  %v1659_v56 = vand.u32 2, %v1499_v60  ;;  %v2833_v40 = vadd.f32 %v573_v57, %v2549_v10 }
 0x139   :  { %v987_v6 = vadd.f32 0.008332161, %v955_v20  ;;  %v2047_v61 = vadd.f32 -0.0013887316, %v1179_v12  ;;  %v1596_v15 = vsel %vm2810_vm9, %v1436_v39, %v1148_v19  ;;  %v1628_v54 = vsel %vm2810_vm9, %v1148_v19, %v1436_v39 }
 0x13a   :  { %v926_v25 = vmul.f32 %v2830_v52, %v2830_v52  ;;  %v2841_v13 = vand.u32 3, %v2089_v4  ;;  %v1724_v22 = vsub.f32 0.0, %v1596_v15  ;;  %v1884_v21 = vsub.f32 0.0, %v1628_v54 }
 0x13b   :  { %v1019_v50 = vmul.f32 %v987_v6, %v923_v2  ;;  %v1243_v29 = vmul.f32 %v2047_v61, %v923_v2  ;;  %v1819_v24 = vand.u32 2, %v1787_v17  ;;  %v576_v46 = vmul.f32 %v2656_v37, %v470_v30 }
 0x13c   :  { %v958_v10 = vmul.f32 -0.00019515296, %v926_v25  ;;  %v1182_v23 = vmul.f32 2.4433157e-05, %v926_v25  ;;  %v1756_v60 = vsel %vm2818_vm10, %v1724_v22, %v1596_v15  ;;  %v1916_v41 = vsel %vm2822_vm11, %v1884_v21, %v1628_v54 }
 0x13d   :  { %v2015_v45 = vadd.f32 -0.16666655, %v1019_v50  ;;  %v1275_v53 = vadd.f32 0.041666646, %v1243_v29  ;;  %1948 = vst [vmem:[%s3810_s2 + $0x40] sm:$0xff] %v1756_v60  ;;  %1980 = vst [vmem:[%s3810_s2 + $0x48] sm:$0xff] %v1916_v41  ;;  %v575_v36 = vmul.f32 %v2656_v37, %v466_v27  ;;  %v608_v19 = vadd.f32 %v576_v46, %v2563_v26 }
 0x13e   :  { %v1371_v0 = vmul.f32 0.5, %v923_v2  ;;  %vm2854_vm12 = vcmp.ne.s32.totalorder %v1531_v33, 0  ;;  %v990_v49 = vadd.f32 0.008332161, %v958_v10  ;;  %v2050_v57 = vadd.f32 -0.0013887316, %v1182_v23 }
 0x13f   :  { %v1083_v8 = vmul.f32 %v2015_v45, %v923_v2  ;;  %v1307_v62 = vmul.f32 %v1275_v53, %v923_v2  ;;  %v1534_v42 = vand.u32 1, %v2841_v13  ;;  %v637_v18 = vmul.f32 0.63661975, %v2833_v40 }
 0x140   :  { %v1022_v20 = vmul.f32 %v990_v49, %v926_v25  ;;  %v1246_v12 = vmul.f32 %v2050_v57, %v926_v25  ;;  %v1790_v17 = vadd.s32 1, %v2841_v13  ;;  %vm2864_vm13 = vcmp.ne.s32.totalorder %v1659_v56, 0 }
 0x141   :  { %v1115_v33 = vmul.f32 %v1083_v8, %v2814_v9  ;;  %v1339_v39 = vmul.f32 %v1307_v62, %v923_v2  ;;  %vm2868_vm14 = vcmp.ne.s32.totalorder %v1819_v24, 0  ;;  %v1374_v61 = vmul.f32 0.5, %v926_v25 }
 0x142   :  { %v669_v30 = vadd.f32 0.5, %v637_v18  ;;  %v2018_v15 = vadd.f32 -0.16666655, %v1022_v20  ;;  %v1278_v54 = vadd.f32 0.041666646, %v1246_v12  ;;  %v2873_v21 = vadd.f32 %v575_v36, %v2558_v44 }
 0x143   :  { %v640_v22 = vmul.f32 0.63661975, %v608_v19  ;;  %v1403_v26 = vsub.f32 %v1339_v39, %v1371_v0  ;;  %vm2875_vm15 = vcmp.ne.s32.totalorder %v1534_v42, 0  ;;  %v1662_v2 = vand.u32 2, %v2841_v13 }
 0x144   :  { %v701_v56 = vfloor.f32 %v669_v30  ;;  %v1086_v29 = vmul.f32 %v2018_v15, %v926_v25  ;;  %v1310_v27 = vmul.f32 %v1278_v54, %v926_v25  ;;  %v1822_v24 = vand.u32 2, %v1790_v17 }
 0x145   :  { %v672_v10 = vadd.f32 0.5, %v640_v22  ;;  %v1147_v23 = vadd.f32 %v1115_v33, %v2814_v9  ;;  %v1435_v46 = vadd.f32 1.0, %v1403_v26  ;;  %v639_v41 = vmul.f32 0.63661975, %v2873_v21 }
 0x146   :  { %v733_v60 = vmul.f32 1.5703125, %v701_v56  ;;  %v1118_v44 = vmul.f32 %v1086_v29, %v2830_v52  ;;  %v1342_v45 = vmul.f32 %v1310_v27, %v926_v25  ;;  %v2086_v53 = vtrunc.f32 %v701_v56 }
 0x147   :  { %v704_v0 = vfloor.f32 %v672_v10  ;;  %v1595_v49 = vsel %vm2854_vm12, %v1435_v46, %v1147_v23  ;;  %v1627_v13 = vsel %vm2854_vm12, %v1147_v23, %v1435_v46  ;;  %v797_v36 = vmul.f32 0.0004837513, %v701_v56 }
 0x148   :  { %v765_v57 = vsub.f32 %v2833_v40, %v733_v60  ;;  %v1723_v8 = vsub.f32 0.0, %v1595_v49  ;;  %v1883_v9 = vsub.f32 0.0, %v1627_v13  ;;  %v1406_v62 = vsub.f32 %v1342_v45, %v1374_v61 }
 0x149   :  { %v861_v42 = vmul.f32 7.54979e-08, %v701_v56  ;;  %v1150_v18 = vadd.f32 %v1118_v44, %v2830_v52  ;;  %v736_v12 = vmul.f32 1.5703125, %v704_v0  ;;  %v671_v25 = vadd.f32 0.5, %v639_v41 }
 0x14a   :  { %v829_v20 = vsub.f32 %v765_v57, %v797_v36  ;;  %v1755_v17 = vsel %vm2864_vm13, %v1723_v8, %v1595_v49  ;;  %v1915_v33 = vsel %vm2868_vm14, %v1883_v9, %v1627_v13  ;;  %v1438_v35 = vadd.f32 1.0, %v1406_v62 }
 0x14b   :  { %v2087_v39 = vcvt.f32.s32 %v2086_v53  ;;  %1947 = vst [vmem:[%s3810_s2 + $0x30] sm:$0xff] %v1755_v17  ;;  %1979 = vst [vmem:[%s3810_s2 + $0x38] sm:$0xff] %v1915_v33  ;;  %vm2899_vm0 = vcmp.ne.s32.totalorder %v1662_v2, 0  ;;  %v768_v4 = vsub.f32 %v608_v19, %v736_v12  ;;  %v2092_v61 = vtrunc.f32 %v704_v0  ;;  %v478_v19 = vpop.permute.xlu0 %477 }
 0x14c   :  { %v2903_v40 = vsub.f32 %v829_v20, %v861_v42  ;;  %v1598_v6 = vsel %vm2875_vm15, %v1438_v35, %v1150_v18  ;;  %v1630_v30 = vsel %vm2875_vm15, %v1150_v18, %v1438_v35  ;;  %vm1854_vm1 = vcmp.ne.s32.totalorder %v1822_v24, 0 }
 0x14d   :  { %v800_v15 = vmul.f32 0.0004837513, %v704_v0  ;;  %v1726_v54 = vsub.f32 0.0, %v1598_v6  ;;  %v1886_v22 = vsub.f32 0.0, %v1630_v30  ;;  %v864_v2 = vmul.f32 7.54979e-08, %v704_v0 }
 0x14e   :  { %v925_v26 = vmul.f32 %v2903_v40, %v2903_v40  ;;  %v1501_v56 = vand.u32 3, %v2087_v39  ;;  %v2093_v27 = vcvt.f32.s32 %v2092_v61  ;;  %v703_v10 = vfloor.f32 %v671_v25 }
 0x14f   :  { %v832_v29 = vsub.f32 %v768_v4, %v800_v15  ;;  %v1758_v23 = vsel %vm2899_vm0, %v1726_v54, %v1598_v6  ;;  %v1918_v46 = vsel %vm1854_vm1, %v1886_v22, %v1630_v30  ;;  %v578_v45 = vmul.f32 %v2656_v37, %v478_v19 }
 0x150   :  { %v957_v60 = vmul.f32 -0.00019515296, %v925_v26  ;;  %v1181_v50 = vmul.f32 2.4433157e-05, %v925_v26  ;;  %1950 = vst [vmem:[%s3810_s2 + $0x60] sm:$0xff] %v1758_v23  ;;  %1982 = vst [vmem:[%s3810_s2 + $0x68] sm:$0xff] %v1918_v46  ;;  %v2090_v18 = vtrunc.f32 %v703_v10 }
 0x151   :  { %v2919_v44 = vsub.f32 %v832_v29, %v864_v2  ;;  %v1533_v53 = vand.u32 1, %v1501_v56  ;;  %v1789_v0 = vadd.s32 1, %v1501_v56  ;;  %v735_v49 = vmul.f32 1.5703125, %v703_v10 }
 0x152   :  { %v989_v24 = vadd.f32 0.008332161, %v957_v60  ;;  %v2049_v41 = vadd.f32 -0.0013887316, %v1181_v50  ;;  %v1504_v8 = vand.u32 3, %v2093_v27  ;;  %v1373_v9 = vmul.f32 0.5, %v925_v26 }
 0x153   :  { %v928_v36 = vmul.f32 %v2919_v44, %v2919_v44  ;;  %v1661_v62 = vand.u32 2, %v1501_v56  ;;  %v767_v42 = vsub.f32 %v2873_v21, %v735_v49  ;;  %v2926_v17 = vadd.f32 %v578_v45, %v2571_v48  ;;  %v474_v45 = vpop.permute.xlu1 %473 }
 0x154   :  { %v1021_v13 = vmul.f32 %v989_v24, %v925_v26  ;;  %v1245_v57 = vmul.f32 %v2049_v41, %v925_v26  ;;  %vm2928_vm2 = vcmp.ne.s32.totalorder %v1533_v53, 0  ;;  %v1821_v35 = vand.u32 2, %v1789_v0 }
 0x155   :  { %v960_v25 = vmul.f32 -0.00019515296, %v928_v36  ;;  %v1184_v39 = vmul.f32 2.4433157e-05, %v928_v36  ;;  %v799_v52 = vmul.f32 0.0004837513, %v703_v10  ;;  %v1536_v15 = vand.u32 1, %v1504_v8 }
 0x156   :  { %v2017_v20 = vadd.f32 -0.16666655, %v1021_v13  ;;  %v1277_v12 = vadd.f32 0.041666646, %v1245_v57  ;;  %v863_v4 = vmul.f32 7.54979e-08, %v703_v10  ;;  %v2091_v27 = vcvt.f32.s32 %v2090_v18 }
 0x157   :  { %v992_v30 = vadd.f32 0.008332161, %v960_v25  ;;  %v2052_v21 = vadd.f32 -0.0013887316, %v1184_v39  ;;  %v1792_v54 = vadd.s32 1, %v1504_v8  ;;  %v831_v22 = vsub.f32 %v767_v42, %v799_v52 }
 0x158   :  { %v1085_v61 = vmul.f32 %v2017_v20, %v925_v26  ;;  %v1309_v6 = vmul.f32 %v1277_v12, %v925_v26  ;;  %v642_v2 = vmul.f32 0.63661975, %v2926_v17  ;;  %vm2934_vm3 = vcmp.ne.s32.totalorder %v1661_v62, 0 }
 0x159   :  { %v1024_v29 = vmul.f32 %v992_v30, %v928_v36  ;;  %vm2938_vm4 = vcmp.ne.s32.totalorder %v1821_v35, 0  ;;  %v1248_v23 = vmul.f32 %v2052_v21, %v928_v36  ;;  %v2942_v46 = vsub.f32 %v831_v22, %v863_v4 }
 0x15a   :  { %v1117_v48 = vmul.f32 %v1085_v61, %v2903_v40  ;;  %v1341_v56 = vmul.f32 %v1309_v6, %v925_v26  ;;  %v1664_v24 = vand.u32 2, %v1504_v8  ;;  %v674_v41 = vadd.f32 0.5, %v642_v2 }
 0x15b   :  { %v2020_v50 = vadd.f32 -0.16666655, %v1024_v29  ;;  %v1280_v53 = vadd.f32 0.041666646, %v1248_v23  ;;  %v1376_v26 = vmul.f32 0.5, %v928_v36  ;;  %v1824_v0 = vand.u32 2, %v1792_v54  ;;  %v486_v29 = vpop.permute.xlu0 %485 }
 0x15c   :  { %v1405_v60 = vsub.f32 %v1341_v56, %v1373_v9  ;;  %v927_v49 = vmul.f32 %v2942_v46, %v2942_v46  ;;  %v1149_v13 = vadd.f32 %v1117_v48, %v2903_v40  ;;  %vm2947_vm5 = vcmp.ne.s32.totalorder %v1536_v15, 0 }
 0x15d   :  { %v1088_v62 = vmul.f32 %v2020_v50, %v928_v36  ;;  %v2951_v18 = vand.u32 3, %v2091_v27  ;;  %v1312_v9 = vmul.f32 %v1280_v53, %v928_v36  ;;  %v577_v12 = vmul.f32 %v2656_v37, %v474_v45 }
 0x15e   :  { %v1437_v57 = vadd.f32 1.0, %v1405_v60  ;;  %v959_v8 = vmul.f32 -0.00019515296, %v927_v49  ;;  %v1183_v20 = vmul.f32 2.4433157e-05, %v927_v49  ;;  %v706_v39 = vfloor.f32 %v674_v41 }
 0x15f   :  { %v1120_v40 = vmul.f32 %v1088_v62, %v2919_v44  ;;  %v1344_v61 = vmul.f32 %v1312_v9, %v928_v36  ;;  %vm2959_vm6 = vcmp.ne.s32.totalorder %v1664_v24, 0  ;;  %vm2963_vm7 = vcmp.ne.s32.totalorder %v1824_v0, 0 }
 0x160   :  { %v1597_v25 = vsel %vm2928_vm2, %v1437_v57, %v1149_v13  ;;  %v1629_v35 = vsel %vm2928_vm2, %v1149_v13, %v1437_v57  ;;  %v991_v15 = vadd.f32 0.008332161, %v959_v8  ;;  %v2051_v21 = vadd.f32 -0.0013887316, %v1183_v20 }
 0x161   :  { %v1725_v52 = vsub.f32 0.0, %v1597_v25  ;;  %v1885_v4 = vsub.f32 0.0, %v1629_v35  ;;  %v1535_v54 = vand.u32 1, %v2951_v18  ;;  %v1663_v33 = vand.u32 2, %v2951_v18 }
 0x162   :  { %v1791_v22 = vadd.s32 1, %v2951_v18  ;;  %v1408_v48 = vsub.f32 %v1344_v61, %v1376_v26  ;;  %v1023_v56 = vmul.f32 %v991_v15, %v927_v49  ;;  %v1152_v27 = vadd.f32 %v1120_v40, %v2919_v44 }
 0x163   :  { %v1757_v2 = vsel %vm2934_vm3, %v1725_v52, %v1597_v25  ;;  %v1917_v36 = vsel %vm2938_vm4, %v1885_v4, %v1629_v35  ;;  %v1247_v23 = vmul.f32 %v2051_v21, %v927_v49  ;;  %v738_v60 = vmul.f32 1.5703125, %v706_v39  ;;  %v482_v52 = vpop.permute.xlu1 %481 }
 0x164   :  { %1949 = vst [vmem:[%s3810_s2 + $0x50] sm:$0xff] %v1757_v2  ;;  %1981 = vst [vmem:[%s3810_s2 + $0x58] sm:$0xff] %v1917_v36  ;;  %v802_v19 = vmul.f32 0.0004837513, %v706_v39  ;;  %v1440_v50 = vadd.f32 1.0, %v1408_v48  ;;  %v2019_v24 = vadd.f32 -0.16666655, %v1023_v56  ;;  %v2096_v41 = vtrunc.f32 %v706_v39 }
 0x165   :  { %v866_v10 = vmul.f32 7.54979e-08, %v706_v39  ;;  %v1279_v45 = vadd.f32 0.041666646, %v1247_v23  ;;  %v770_v53 = vsub.f32 %v2926_v17, %v738_v60  ;;  %v609_v26 = vadd.f32 %v577_v12, %v2566_v47 }
 0x166   :  { %v580_v0 = vmul.f32 %v2656_v37, %v486_v29  ;;  %v1600_v13 = vsel %vm2947_vm5, %v1440_v50, %v1152_v27  ;;  %v1632_v44 = vsel %vm2947_vm5, %v1152_v27, %v1440_v50  ;;  %v1087_v57 = vmul.f32 %v2019_v24, %v927_v49 }
 0x167   :  { %v2097_v62 = vcvt.f32.s32 %v2096_v41  ;;  %v1728_v18 = vsub.f32 0.0, %v1600_v13  ;;  %v1888_v9 = vsub.f32 0.0, %v1632_v44  ;;  %v1311_v8 = vmul.f32 %v1279_v45, %v927_v49 }
 0x168   :  { %v834_v20 = vsub.f32 %v770_v53, %v802_v19  ;;  %v1119_v25 = vmul.f32 %v1087_v57, %v2942_v46  ;;  %v1375_v35 = vmul.f32 0.5, %v927_v49  ;;  %v641_v17 = vmul.f32 0.63661975, %v609_v26 }
 0x169   :  { %v2990_v47 = vadd.f32 %v580_v0, %v2579_v51  ;;  %v1760_v12 = vsel %vm2959_vm6, %v1728_v18, %v1600_v13  ;;  %v1920_v42 = vsel %vm2963_vm7, %v1888_v9, %v1632_v44  ;;  %v1343_v40 = vmul.f32 %v1311_v8, %v927_v49 }
 0x16a   :  { %v2996_v39 = vsub.f32 %v834_v20, %v866_v10  ;;  %1952 = vst [vmem:[%s3810_s2 + $0x80] sm:$0xff] %v1760_v12  ;;  %1984 = vst [vmem:[%s3810_s2 + $0x88] sm:$0xff] %v1920_v42  ;;  %v1823_v51 = vand.u32 2, %v1791_v22  ;;  %v1506_v4 = vand.u32 3, %v2097_v62  ;;  %v673_v30 = vadd.f32 0.5, %v641_v17 }
 0x16b   :  { %v1407_v61 = vsub.f32 %v1343_v40, %v1375_v35  ;;  %v644_v49 = vmul.f32 0.63661975, %v2990_v47  ;;  %vm1567_vm8 = vcmp.ne.s32.totalorder %v1535_v54, 0  ;;  %vm3007_vm9 = vcmp.ne.s32.totalorder %v1663_v33, 0 }
 0x16c   :  { %v930_v6 = vmul.f32 %v2996_v39, %v2996_v39  ;;  %v579_v21 = vmul.f32 %v2656_v37, %v482_v52  ;;  %v1151_v2 = vadd.f32 %v1119_v25, %v2942_v46  ;;  %vm3013_vm10 = vcmp.ne.s32.totalorder %v1823_v51, 0 }
 0x16d   :  { %v1439_v36 = vadd.f32 1.0, %v1407_v61  ;;  %v1794_v29 = vadd.s32 1, %v1506_v4  ;;  %v705_v27 = vfloor.f32 %v673_v30  ;;  %v676_v23 = vadd.f32 0.5, %v644_v49 }
 0x16e   :  { %v962_v48 = vmul.f32 -0.00019515296, %v930_v6  ;;  %v1186_v22 = vmul.f32 2.4433157e-05, %v930_v6  ;;  %v3018_v41 = vadd.f32 %v579_v21, %v2574_v58  ;;  %v1538_v9 = vand.u32 1, %v1506_v4 }
 0x16f   :  { %v1599_v60 = vsel %vm1567_vm8, %v1439_v36, %v1151_v2  ;;  %v1631_v54 = vsel %vm1567_vm8, %v1151_v2, %v1439_v36  ;;  %v737_v10 = vmul.f32 1.5703125, %v705_v27  ;;  %v801_v53 = vmul.f32 0.0004837513, %v705_v27 }
 0x170   :  { %v994_v33 = vadd.f32 0.008332161, %v962_v48  ;;  %v2054_v19 = vadd.f32 -0.0013887316, %v1186_v22  ;;  %v1727_v50 = vsub.f32 0.0, %v1599_v60  ;;  %v1887_v24 = vsub.f32 0.0, %v1631_v54 }
 0x171   :  { %v2094_v0 = vtrunc.f32 %v705_v27  ;;  %v769_v57 = vsub.f32 %v609_v26, %v737_v10  ;;  %v708_v62 = vfloor.f32 %v676_v23  ;;  %v1666_v20 = vand.u32 2, %v1506_v4  ;;  %v494_v4 = vpop.permute.xlu0 %493 }
 0x172   :  { %v1026_v46 = vmul.f32 %v994_v33, %v930_v6  ;;  %v1250_v45 = vmul.f32 %v2054_v19, %v930_v6  ;;  %v1759_v13 = vsel %vm3007_vm9, %v1727_v50, %v1599_v60  ;;  %v1919_v44 = vsel %vm3013_vm10, %v1887_v24, %v1631_v54 }
 0x173   :  { %1951 = vst [vmem:[%s3810_s2 + $0x70] sm:$0xff] %v1759_v13  ;;  %1983 = vst [vmem:[%s3810_s2 + $0x78] sm:$0xff] %v1919_v44  ;;  %v2095_v8 = vcvt.f32.s32 %v2094_v0  ;;  %v833_v25 = vsub.f32 %v769_v57, %v801_v53  ;;  %v865_v35 = vmul.f32 7.54979e-08, %v705_v27  ;;  %v740_v17 = vmul.f32 1.5703125, %v708_v62 }
 0x174   :  { %v2022_v58 = vadd.f32 -0.16666655, %v1026_v46  ;;  %v1282_v18 = vadd.f32 0.041666646, %v1250_v45  ;;  %v2100_v26 = vtrunc.f32 %v708_v62  ;;  %v643_v40 = vmul.f32 0.63661975, %v3018_v41 }
 0x175   :  { %v1826_v52 = vand.u32 2, %v1794_v29  ;;  %v3031_v51 = vsub.f32 %v833_v25, %v865_v35  ;;  %v772_v61 = vsub.f32 %v2990_v47, %v740_v17  ;;  %v804_v30 = vmul.f32 0.0004837513, %v708_v62 }
 0x176   :  { %v1090_v12 = vmul.f32 %v2022_v58, %v930_v6  ;;  %v1314_v42 = vmul.f32 %v1282_v18, %v930_v6  ;;  %v1378_v21 = vmul.f32 0.5, %v930_v6  ;;  %v1505_v2 = vand.u32 3, %v2095_v8 }
 0x177   :  { %vm3035_vm11 = vcmp.ne.s32.totalorder %v1538_v9, 0  ;;  %v929_v48 = vmul.f32 %v3031_v51, %v3031_v51  ;;  %v836_v22 = vsub.f32 %v772_v61, %v804_v30  ;;  %v2101_v56 = vcvt.f32.s32 %v2100_v26 }
 0x178   :  { %v1122_v49 = vmul.f32 %v1090_v12, %v2996_v39  ;;  %v1346_v15 = vmul.f32 %v1314_v42, %v930_v6  ;;  %vm3041_vm12 = vcmp.ne.s32.totalorder %v1666_v20, 0  ;;  %v868_v47 = vmul.f32 7.54979e-08, %v708_v62 }
 0x179   :  { %v675_v23 = vadd.f32 0.5, %v643_v40  ;;  %vm3045_vm13 = vcmp.ne.s32.totalorder %v1826_v52, 0  ;;  %v961_v60 = vmul.f32 -0.00019515296, %v929_v48  ;;  %v1185_v54 = vmul.f32 2.4433157e-05, %v929_v48 }
 0x17a   :  { %v1410_v29 = vsub.f32 %v1346_v15, %v1378_v21  ;;  %v582_v33 = vmul.f32 %v2656_v37, %v494_v4  ;;  %v1154_v19 = vadd.f32 %v1122_v49, %v2996_v39  ;;  %v1793_v24 = vadd.s32 1, %v1505_v2 }
 0x17b   :  { %v3051_v10 = vsub.f32 %v836_v22, %v868_v47  ;;  %v993_v46 = vadd.f32 0.008332161, %v961_v60  ;;  %v2053_v45 = vadd.f32 -0.0013887316, %v1185_v54  ;;  %v1537_v53 = vand.u32 1, %v1505_v2 }
 0x17c   :  { %v1442_v50 = vadd.f32 1.0, %v1410_v29  ;;  %v1508_v0 = vand.u32 3, %v2101_v56  ;;  %v707_v62 = vfloor.f32 %v675_v23  ;;  %v1665_v8 = vand.u32 2, %v1505_v2 }
 0x17d   :  { %v932_v57 = vmul.f32 %v3051_v10, %v3051_v10  ;;  %v1025_v18 = vmul.f32 %v993_v46, %v929_v48  ;;  %v1249_v9 = vmul.f32 %v2053_v45, %v929_v48  ;;  %v1825_v20 = vand.u32 2, %v1793_v24 }
 0x17e   :  { %v1602_v13 = vsel %vm3035_vm11, %v1442_v50, %v1154_v19  ;;  %v1634_v44 = vsel %vm3035_vm11, %v1154_v19, %v1442_v50  ;;  %v1377_v40 = vmul.f32 0.5, %v929_v48  ;;  %vm3069_vm14 = vcmp.ne.s32.totalorder %v1537_v53, 0 }
 0x17f   :  { %v1730_v58 = vsub.f32 0.0, %v1602_v13  ;;  %v1890_v39 = vsub.f32 0.0, %v1634_v44  ;;  %v964_v25 = vmul.f32 -0.00019515296, %v932_v57  ;;  %v1188_v35 = vmul.f32 2.4433157e-05, %v932_v57 }
 0x180   :  { %v2021_v42 = vadd.f32 -0.16666655, %v1025_v18  ;;  %v1281_v26 = vadd.f32 0.041666646, %v1249_v9  ;;  %v3074_v49 = vadd.f32 %v582_v33, %v2587_v55  ;;  %v1540_v2 = vand.u32 1, %v1508_v0 }
 0x181   :  { %v1762_v17 = vsel %vm3041_vm12, %v1730_v58, %v1602_v13  ;;  %v1922_v12 = vsel %vm3045_vm13, %v1890_v39, %v1634_v44  ;;  %v996_v61 = vadd.f32 0.008332161, %v964_v25  ;;  %v2056_v30 = vadd.f32 -0.0013887316, %v1188_v35  ;;  %v490_v13 = vpop.permute.xlu1 %489 }
 0x182   :  { %1954 = vst [vmem:[%s3810_s2 + $0xa0] sm:$0xff] %v1762_v17  ;;  %1986 = vst [vmem:[%s3810_s2 + $0xa8] sm:$0xff] %v1922_v12  ;;  %v1089_v15 = vmul.f32 %v2021_v42, %v929_v48  ;;  %v1313_v21 = vmul.f32 %v1281_v26, %v929_v48  ;;  %v739_v4 = vmul.f32 1.5703125, %v707_v62  ;;  %v1380_v56 = vmul.f32 0.5, %v932_v57  ;;  %v502_v17 = vpop.permute.xlu0 %501 }
 0x183   :  { %v1028_v36 = vmul.f32 %v996_v61, %v932_v57  ;;  %v1252_v22 = vmul.f32 %v2056_v30, %v932_v57  ;;  %v1796_v29 = vadd.s32 1, %v1508_v0  ;;  %vm3077_vm15 = vcmp.ne.s32.totalorder %v1665_v8, 0 }
 0x184   :  { %v1121_v27 = vmul.f32 %v1089_v15, %v3031_v51  ;;  %v1345_v47 = vmul.f32 %v1313_v21, %v929_v48  ;;  %vm3081_vm0 = vcmp.ne.s32.totalorder %v1825_v20, 0  ;;  %v771_v55 = vsub.f32 %v3018_v41, %v739_v4 }
 0x185   :  { %v803_v60 = vmul.f32 0.0004837513, %v707_v62  ;;  %v2024_v54 = vadd.f32 -0.16666655, %v1028_v36  ;;  %v1284_v33 = vadd.f32 0.041666646, %v1252_v22  ;;  %v1668_v19 = vand.u32 2, %v1508_v0 }
 0x186   :  { %v2098_v50 = vtrunc.f32 %v707_v62  ;;  %v1409_v24 = vsub.f32 %v1345_v47, %v1377_v40  ;;  %vm3086_vm1 = vcmp.ne.s32.totalorder %v1540_v2, 0  ;;  %v867_v45 = vmul.f32 7.54979e-08, %v707_v62 }
 0x187   :  { %v835_v48 = vsub.f32 %v771_v55, %v803_v60  ;;  %v646_v53 = vmul.f32 0.63661975, %v3074_v49  ;;  %v1092_v44 = vmul.f32 %v2024_v54, %v932_v57  ;;  %v1316_v58 = vmul.f32 %v1284_v33, %v932_v57 }
 0x188   :  { %v1828_v39 = vand.u32 2, %v1796_v29  ;;  %v2099_v18 = vcvt.f32.s32 %v2098_v50  ;;  %v1153_v41 = vadd.f32 %v1121_v27, %v3031_v51  ;;  %v1441_v9 = vadd.f32 1.0, %v1409_v24 }
 0x189   :  { %v3092_v8 = vsub.f32 %v835_v48, %v867_v45  ;;  %v678_v0 = vadd.f32 0.5, %v646_v53  ;;  %v1124_v20 = vmul.f32 %v1092_v44, %v3051_v10  ;;  %v1348_v25 = vmul.f32 %v1316_v58, %v932_v57 }
 0x18a   :  { %vm3095_vm2 = vcmp.ne.s32.totalorder %v1668_v19, 0  ;;  %v581_v62 = vmul.f32 %v2656_v37, %v490_v13  ;;  %v1601_v12 = vsel %vm3069_vm14, %v1441_v9, %v1153_v41  ;;  %v1633_v51 = vsel %vm3069_vm14, %v1153_v41, %v1441_v9  ;;  %v498_v13 = vpop.permute.xlu1 %497  ;;  %v510_v9 = vpop.permute.xlu0 %509 }
 0x18b   :  { %v931_v42 = vmul.f32 %v3092_v8, %v3092_v8  ;;  %v1507_v26 = vand.u32 3, %v2099_v18  ;;  %v1729_v40 = vsub.f32 0.0, %v1601_v12  ;;  %v1889_v61 = vsub.f32 0.0, %v1633_v51 }
 0x18c   :  { %v1412_v57 = vsub.f32 %v1348_v25, %v1380_v56  ;;  %v710_v30 = vfloor.f32 %v678_v0  ;;  %vm3106_vm3 = vcmp.ne.s32.totalorder %v1828_v39, 0  ;;  %v584_v4 = vmul.f32 %v2656_v37, %v502_v17 }
 0x18d   :  { %v963_v21 = vmul.f32 -0.00019515296, %v931_v42  ;;  %v1187_v2 = vmul.f32 2.4433157e-05, %v931_v42  ;;  %v1761_v52 = vsel %vm3077_vm15, %v1729_v40, %v1601_v12  ;;  %v1921_v36 = vsel %vm3081_vm0, %v1889_v61, %v1633_v51 }
 0x18e   :  { %v1156_v22 = vadd.f32 %v1124_v20, %v3051_v10  ;;  %v1444_v29 = vadd.f32 1.0, %v1412_v57  ;;  %1953 = vst [vmem:[%s3810_s2 + $0x90] sm:$0xff] %v1761_v52  ;;  %1985 = vst [vmem:[%s3810_s2 + $0x98] sm:$0xff] %v1921_v36  ;;  %v1379_v47 = vmul.f32 0.5, %v931_v42  ;;  %v3123_v23 = vadd.f32 %v581_v62, %v2582_v1 }
 0x18f   :  { %v995_v56 = vadd.f32 0.008332161, %v963_v21  ;;  %v2055_v27 = vadd.f32 -0.0013887316, %v1187_v2  ;;  %v1539_v55 = vand.u32 1, %v1507_v26  ;;  %v742_v60 = vmul.f32 1.5703125, %v710_v30 }
 0x190   :  { %v1604_v6 = vsel %vm3086_vm1, %v1444_v29, %v1156_v22  ;;  %v1636_v10 = vsel %vm3086_vm1, %v1156_v22, %v1444_v29  ;;  %v1667_v24 = vand.u32 2, %v1507_v26  ;;  %v1795_v48 = vadd.s32 1, %v1507_v26 }
 0x191   :  { %v1732_v54 = vsub.f32 0.0, %v1604_v6  ;;  %v1892_v33 = vsub.f32 0.0, %v1636_v10  ;;  %v1027_v19 = vmul.f32 %v995_v56, %v931_v42  ;;  %v1251_v50 = vmul.f32 %v2055_v27, %v931_v42 }
 0x192   :  { %v774_v45 = vsub.f32 %v3074_v49, %v742_v60  ;;  %v806_v53 = vmul.f32 0.0004837513, %v710_v30  ;;  %v870_v49 = vmul.f32 7.54979e-08, %v710_v30  ;;  %v2104_v18 = vtrunc.f32 %v710_v30 }
 0x193   :  { %v1764_v1 = vsel %vm3095_vm2, %v1732_v54, %v1604_v6  ;;  %v1924_v44 = vsel %vm3106_vm3, %v1892_v33, %v1636_v10  ;;  %v2023_v46 = vadd.f32 -0.16666655, %v1027_v19  ;;  %v1283_v58 = vadd.f32 0.041666646, %v1251_v50 }
 0x194   :  { %1956 = vst [vmem:[%s3810_s2 + $0xc0] sm:$0xff] %v1764_v1  ;;  %1988 = vst [vmem:[%s3810_s2 + $0xc8] sm:$0xff] %v1924_v44  ;;  %v838_v39 = vsub.f32 %v774_v45, %v806_v53  ;;  %v645_v41 = vmul.f32 0.63661975, %v3123_v23  ;;  %v3142_v25 = vadd.f32 %v584_v4, %v2595_v59  ;;  %v583_v35 = vmul.f32 %v2656_v37, %v498_v13 }
 0x195   :  { %v1091_v0 = vmul.f32 %v2023_v46, %v931_v42  ;;  %v1315_v20 = vmul.f32 %v1283_v58, %v931_v42  ;;  %v1827_v62 = vand.u32 2, %v1795_v48  ;;  %v2105_v12 = vcvt.f32.s32 %v2104_v18 }
 0x196   :  { %v3145_v17 = vsub.f32 %v838_v39, %v870_v49  ;;  %v677_v51 = vadd.f32 0.5, %v645_v41  ;;  %v648_v61 = vmul.f32 0.63661975, %v3142_v25  ;;  %v586_v57 = vmul.f32 %v2656_v37, %v510_v9 }
 0x197   :  { %v1123_v26 = vmul.f32 %v1091_v0, %v3092_v8  ;;  %v1347_v40 = vmul.f32 %v1315_v20, %v931_v42  ;;  %v1510_v15 = vand.u32 3, %v2105_v12  ;;  %v3153_v21 = vadd.f32 %v583_v35, %v2590_v38 }
 0x198   :  { %v934_v30 = vmul.f32 %v3145_v17, %v3145_v17  ;;  %v709_v59 = vfloor.f32 %v677_v51  ;;  %vm1571_vm4 = vcmp.ne.s32.totalorder %v1539_v55, 0  ;;  %vm3155_vm5 = vcmp.ne.s32.totalorder %v1667_v24, 0 }
 0x199   :  { %v1411_v2 = vsub.f32 %v1347_v40, %v1379_v47  ;;  %v1155_v42 = vadd.f32 %v1123_v26, %v3092_v8  ;;  %vm3160_vm6 = vcmp.ne.s32.totalorder %v1827_v62, 0  ;;  %v1798_v56 = vadd.s32 1, %v1510_v15 }
 0x19a   :  { %v966_v36 = vmul.f32 -0.00019515296, %v934_v30  ;;  %v1190_v22 = vmul.f32 2.4433157e-05, %v934_v30  ;;  %v741_v27 = vmul.f32 1.5703125, %v709_v59  ;;  %v680_v6 = vadd.f32 0.5, %v648_v61 }
 0x19b   :  { %v1443_v29 = vadd.f32 1.0, %v1411_v2  ;;  %v647_v47 = vmul.f32 0.63661975, %v3153_v21  ;;  %v3166_v55 = vadd.f32 %v586_v57, %v2603_v63  ;;  %v1542_v8 = vand.u32 1, %v1510_v15 }
 0x19c   :  { %v998_v38 = vadd.f32 0.008332161, %v966_v36  ;;  %v2058_v10 = vadd.f32 -0.0013887316, %v1190_v22  ;;  %v1670_v33 = vand.u32 2, %v1510_v15  ;;  %v1830_v45 = vand.u32 2, %v1798_v56  ;;  %v506_v36 = vpop.permute.xlu1 %505 }
 0x19d   :  { %v1603_v60 = vsel %vm1571_vm4, %v1443_v29, %v1155_v42  ;;  %v1635_v54 = vsel %vm1571_vm4, %v1155_v42, %v1443_v29  ;;  %v773_v53 = vsub.f32 %v3123_v23, %v741_v27  ;;  %v805_v13 = vmul.f32 0.0004837513, %v709_v59 }
 0x19e   :  { %v1731_v19 = vsub.f32 0.0, %v1603_v60  ;;  %v1891_v50 = vsub.f32 0.0, %v1635_v54  ;;  %v1030_v24 = vmul.f32 %v998_v38, %v934_v30  ;;  %v1254_v48 = vmul.f32 %v2058_v10, %v934_v30 }
 0x19f   :  { %v2102_v1 = vtrunc.f32 %v709_v59  ;;  %v837_v39 = vsub.f32 %v773_v53, %v805_v13  ;;  %v869_v23 = vmul.f32 7.54979e-08, %v709_v59  ;;  %v712_v18 = vfloor.f32 %v680_v6 }
 0x1a0   :  { %v1763_v44 = vsel %vm3155_vm5, %v1731_v19, %v1603_v60  ;;  %v1923_v63 = vsel %vm3160_vm6, %v1891_v50, %v1635_v54  ;;  %v2026_v46 = vadd.f32 -0.16666655, %v1030_v24  ;;  %v1286_v58 = vadd.f32 0.041666646, %v1254_v48 }
 0x1a1   :  { %1955 = vst [vmem:[%s3810_s2 + $0xb0] sm:$0xff] %v1763_v44  ;;  %1987 = vst [vmem:[%s3810_s2 + $0xb8] sm:$0xff] %v1923_v63  ;;  %v2103_v49 = vcvt.f32.s32 %v2102_v1  ;;  %v1382_v0 = vmul.f32 0.5, %v934_v30  ;;  %vm3179_vm7 = vcmp.ne.s32.totalorder %v1542_v8, 0  ;;  %v3183_v35 = vsub.f32 %v837_v39, %v869_v23 }
 0x1a2   :  { %v1094_v41 = vmul.f32 %v2026_v46, %v934_v30  ;;  %v1318_v9 = vmul.f32 %v1286_v58, %v934_v30  ;;  %v744_v62 = vmul.f32 1.5703125, %v712_v18  ;;  %vm3186_vm8 = vcmp.ne.s32.totalorder %v1670_v33, 0 }
 0x1a3   :  { %v1509_v40 = vand.u32 3, %v2103_v49  ;;  %v2108_v61 = vtrunc.f32 %v712_v18  ;;  %vm3190_vm9 = vcmp.ne.s32.totalorder %v1830_v45, 0  ;;  %v933_v15 = vmul.f32 %v3183_v35, %v3183_v35 }
 0x1a4   :  { %v1126_v12 = vmul.f32 %v1094_v41, %v3145_v17  ;;  %v1350_v51 = vmul.f32 %v1318_v9, %v934_v30  ;;  %v679_v59 = vadd.f32 0.5, %v647_v47  ;;  %v650_v2 = vmul.f32 0.63661975, %v3166_v55 }
 0x1a5   :  { %v776_v42 = vsub.f32 %v3142_v25, %v744_v62  ;;  %v808_v30 = vmul.f32 0.0004837513, %v712_v18  ;;  %v2109_v52 = vcvt.f32.s32 %v2108_v61  ;;  %v965_v22 = vmul.f32 -0.00019515296, %v933_v15 }
 0x1a6   :  { %v1414_v4 = vsub.f32 %v1350_v51, %v1382_v0  ;;  %v1189_v29 = vmul.f32 2.4433157e-05, %v933_v15  ;;  %v872_v56 = vmul.f32 7.54979e-08, %v712_v18  ;;  %v1158_v27 = vadd.f32 %v1126_v12, %v3145_v17 }
 0x1a7   :  { %v1797_v38 = vadd.s32 1, %v1509_v40  ;;  %v840_v10 = vsub.f32 %v776_v42, %v808_v30  ;;  %v997_v60 = vadd.f32 0.008332161, %v965_v22  ;;  %v1541_v8 = vand.u32 1, %v1509_v40 }
 0x1a8   :  { %v1446_v6 = vadd.f32 1.0, %v1414_v4  ;;  %v2057_v54 = vadd.f32 -0.0013887316, %v1189_v29  ;;  %v585_v47 = vmul.f32 %v2656_v37, %v506_v36  ;;  %v1512_v50 = vand.u32 3, %v2109_v52 }
 0x1a9   :  { %v3204_v19 = vsub.f32 %v840_v10, %v872_v56  ;;  %v1029_v17 = vmul.f32 %v997_v60, %v933_v15  ;;  %v1669_v53 = vand.u32 2, %v1509_v40  ;;  %v1829_v13 = vand.u32 2, %v1797_v38 }
 0x1aa   :  { %v1606_v33 = vsel %vm3179_vm7, %v1446_v6, %v1158_v27  ;;  %v1638_v25 = vsel %vm3179_vm7, %v1158_v27, %v1446_v6  ;;  %v1253_v45 = vmul.f32 %v2057_v54, %v933_v15  ;;  %v711_v44 = vfloor.f32 %v679_v59 }
 0x1ab   :  { %v1734_v24 = vsub.f32 0.0, %v1606_v33  ;;  %v1894_v48 = vsub.f32 0.0, %v1638_v25  ;;  %v936_v1 = vmul.f32 %v3204_v19, %v3204_v19  ;;  %v2025_v58 = vadd.f32 -0.16666655, %v1029_v17 }
 0x1ac   :  { %v1285_v39 = vadd.f32 0.041666646, %v1253_v45  ;;  %v1381_v23 = vmul.f32 0.5, %v933_v15  ;;  %vm3218_vm10 = vcmp.ne.s32.totalorder %v1541_v8, 0  ;;  %v1544_v20 = vand.u32 1, %v1512_v50 }
 0x1ad   :  { %v1766_v63 = vsel %vm3186_vm8, %v1734_v24, %v1606_v33  ;;  %v1926_v46 = vsel %vm3190_vm9, %v1894_v48, %v1638_v25  ;;  %v968_v18 = vmul.f32 -0.00019515296, %v936_v1  ;;  %v1192_v41 = vmul.f32 2.4433157e-05, %v936_v1 }
 0x1ae   :  { %1958 = vst [vmem:[%s3810_s2 + $0xe0] sm:$0xff] %v1766_v63  ;;  %1990 = vst [vmem:[%s3810_s2 + $0xe8] sm:$0xff] %v1926_v46  ;;  %v1093_v9 = vmul.f32 %v2025_v58, %v933_v15  ;;  %v1317_v0 = vmul.f32 %v1285_v39, %v933_v15  ;;  %v1800_v62 = vadd.s32 1, %v1512_v50  ;;  %v1672_v26 = vand.u32 2, %v1512_v50 }
 0x1af   :  { %v1000_v12 = vadd.f32 0.008332161, %v968_v18  ;;  %v2060_v51 = vadd.f32 -0.0013887316, %v1192_v41  ;;  %v743_v40 = vmul.f32 1.5703125, %v711_v44  ;;  %vm3223_vm11 = vcmp.ne.s32.totalorder %v1669_v53, 0 }
 0x1b0   :  { %v1125_v61 = vmul.f32 %v1093_v9, %v3183_v35  ;;  %v1349_v57 = vmul.f32 %v1317_v0, %v933_v15  ;;  %vm3227_vm12 = vcmp.ne.s32.totalorder %v1829_v13, 0  ;;  %v1384_v42 = vmul.f32 0.5, %v936_v1  ;;  %v518_v13 = vpop.permute.xlu0 %517 }
 0x1b1   :  { %v807_v30 = vmul.f32 0.0004837513, %v711_v44  ;;  %v1032_v52 = vmul.f32 %v1000_v12, %v936_v1  ;;  %v1256_v36 = vmul.f32 %v2060_v51, %v936_v1  ;;  %v775_v22 = vsub.f32 %v3153_v21, %v743_v40 }
 0x1b2   :  { %v2106_v29 = vtrunc.f32 %v711_v44  ;;  %v1413_v56 = vsub.f32 %v1349_v57, %v1381_v23  ;;  %v1832_v27 = vand.u32 2, %v1800_v62  ;;  %v871_v6 = vmul.f32 7.54979e-08, %v711_v44 }
 0x1b3   :  { %v682_v38 = vadd.f32 0.5, %v650_v2  ;;  %v2028_v15 = vadd.f32 -0.16666655, %v1032_v52  ;;  %v1288_v10 = vadd.f32 0.041666646, %v1256_v36  ;;  %v839_v60 = vsub.f32 %v775_v22, %v807_v30 }
 0x1b4   :  { %v2107_v54 = vcvt.f32.s32 %v2106_v29  ;;  %v1157_v8 = vadd.f32 %v1125_v61, %v3183_v35  ;;  %v1445_v33 = vadd.f32 1.0, %v1413_v56  ;;  %v3234_v50 = vadd.f32 %v585_v47, %v2598_v14  ;;  %v526_v53 = vpop.permute.xlu0 %525 }
 0x1b5   :  { %v714_v25 = vfloor.f32 %v682_v38  ;;  %v1096_v24 = vmul.f32 %v2028_v15, %v936_v1  ;;  %v1320_v48 = vmul.f32 %v1288_v10, %v936_v1  ;;  %v3236_v17 = vsub.f32 %v839_v60, %v871_v6 }
 0x1b6   :  { %v3238_v21 = vand.u32 3, %v2107_v54  ;;  %v1605_v2 = vsel %vm3218_vm10, %v1445_v33, %v1157_v8  ;;  %v1637_v45 = vsel %vm3218_vm10, %v1157_v8, %v1445_v33  ;;  %vm3244_vm13 = vcmp.ne.s32.totalorder %v1544_v20, 0 }
 0x1b7   :  { %v746_v35 = vmul.f32 1.5703125, %v714_v25  ;;  %v1733_v14 = vsub.f32 0.0, %v1605_v2  ;;  %v1893_v47 = vsub.f32 0.0, %v1637_v45  ;;  %v1128_v44 = vmul.f32 %v1096_v24, %v3204_v19  ;;  %v514_v24 = vpop.permute.xlu1 %513 }
 0x1b8   :  { %v1352_v63 = vmul.f32 %v1320_v48, %v936_v1  ;;  %vm3249_vm14 = vcmp.ne.s32.totalorder %v1672_v26, 0  ;;  %vm3253_vm15 = vcmp.ne.s32.totalorder %v1832_v27, 0  ;;  %v935_v39 = vmul.f32 %v3236_v17, %v3236_v17 }
 0x1b9   :  { %v1799_v23 = vadd.s32 1, %v3238_v21  ;;  %v649_v49 = vmul.f32 0.63661975, %v3234_v50  ;;  %v1765_v18 = vsel %vm3223_vm11, %v1733_v14, %v1605_v2  ;;  %v1925_v1 = vsel %vm3227_vm12, %v1893_v47, %v1637_v45 }
 0x1ba   :  { %v1416_v41 = vsub.f32 %v1352_v63, %v1384_v42  ;;  %v588_v9 = vmul.f32 %v2656_v37, %v518_v13  ;;  %1957 = vst [vmem:[%s3810_s2 + $0xd0] sm:$0xff] %v1765_v18  ;;  %1989 = vst [vmem:[%s3810_s2 + $0xd8] sm:$0xff] %v1925_v1  ;;  %v967_v0 = vmul.f32 -0.00019515296, %v935_v39  ;;  %v1191_v20 = vmul.f32 2.4433157e-05, %v935_v39 }
 0x1bb   :  { %v1543_v62 = vand.u32 1, %v3238_v21  ;;  %v810_v12 = vmul.f32 0.0004837513, %v714_v25  ;;  %v1160_v51 = vadd.f32 %v1128_v44, %v3204_v19  ;;  %v1671_v40 = vand.u32 2, %v3238_v21 }
 0x1bc   :  { %v1448_v26 = vadd.f32 1.0, %v1416_v41  ;;  %v778_v61 = vsub.f32 %v3166_v55, %v746_v35  ;;  %v999_v57 = vadd.f32 0.008332161, %v967_v0  ;;  %v2059_v59 = vadd.f32 -0.0013887316, %v1191_v20 }
 0x1bd   :  { %v1831_v4 = vand.u32 2, %v1799_v23  ;;  %v2112_v42 = vtrunc.f32 %v714_v25  ;;  %v874_v22 = vmul.f32 7.54979e-08, %v714_v25  ;;  %v681_v55 = vadd.f32 0.5, %v649_v49 }
 0x1be   :  { %v1608_v30 = vsel %vm3244_vm13, %v1448_v26, %v1160_v51  ;;  %v1640_v52 = vsel %vm3244_vm13, %v1160_v51, %v1448_v26  ;;  %v842_v36 = vsub.f32 %v778_v61, %v810_v12  ;;  %v1031_v19 = vmul.f32 %v999_v57, %v935_v39 }
 0x1bf   :  { %v1736_v29 = vsub.f32 0.0, %v1608_v30  ;;  %v1896_v56 = vsub.f32 0.0, %v1640_v52  ;;  %v1255_v27 = vmul.f32 %v2059_v59, %v935_v39  ;;  %v2113_v38 = vcvt.f32.s32 %v2112_v42 }
 0x1c0   :  { %v3280_v6 = vsub.f32 %v842_v36, %v874_v22  ;;  %v3283_v15 = vadd.f32 %v588_v9, %v2611_v3  ;;  %v2027_v54 = vadd.f32 -0.16666655, %v1031_v19  ;;  %v713_v25 = vfloor.f32 %v681_v55 }
 0x1c1   :  { %v1768_v10 = vsel %vm3249_vm14, %v1736_v29, %v1608_v30  ;;  %v1928_v60 = vsel %vm3253_vm15, %v1896_v56, %v1640_v52  ;;  %v1287_v8 = vadd.f32 0.041666646, %v1255_v27  ;;  %v1514_v33 = vand.u32 3, %v2113_v38 }
 0x1c2   :  { %1960 = vst [vmem:[%s3810_s2 + $0x100] sm:$0xff] %v1768_v10  ;;  %1992 = vst [vmem:[%s3810_s2 + $0x108] sm:$0xff] %v1928_v60  ;;  %v938_v3 = vmul.f32 %v3280_v6, %v3280_v6  ;;  %v1095_v48 = vmul.f32 %v2027_v54, %v935_v39  ;;  %v1383_v2 = vmul.f32 0.5, %v935_v39  ;;  %vm3297_vm0 = vcmp.ne.s32.totalorder %v1543_v62, 0 }
 0x1c3   :  { %v1319_v21 = vmul.f32 %v1287_v8, %v935_v39  ;;  %v652_v14 = vmul.f32 0.63661975, %v3283_v15  ;;  %vm3303_vm1 = vcmp.ne.s32.totalorder %v1671_v40, 0  ;;  %vm3307_vm2 = vcmp.ne.s32.totalorder %v1831_v4, 0 }
 0x1c4   :  { %v970_v35 = vmul.f32 -0.00019515296, %v938_v3  ;;  %v1194_v13 = vmul.f32 2.4433157e-05, %v938_v3  ;;  %v1127_v47 = vmul.f32 %v1095_v48, %v3236_v17  ;;  %v1802_v58 = vadd.s32 1, %v1514_v33 }
 0x1c5   :  { %v1351_v44 = vmul.f32 %v1319_v21, %v935_v39  ;;  %v587_v23 = vmul.f32 %v2656_v37, %v514_v24  ;;  %v745_v1 = vmul.f32 1.5703125, %v713_v25  ;;  %v3313_v41 = vmul.f32 %v2656_v37, %v526_v53 }
 0x1c6   :  { %v1002_v49 = vadd.f32 0.008332161, %v970_v35  ;;  %v2062_v18 = vadd.f32 -0.0013887316, %v1194_v13  ;;  %v1159_v9 = vadd.f32 %v1127_v47, %v3236_v17  ;;  %v1546_v0 = vand.u32 1, %v1514_v33 }
 0x1c7   :  { %v1415_v39 = vsub.f32 %v1351_v44, %v1383_v2  ;;  %v1674_v20 = vand.u32 2, %v1514_v33  ;;  %v777_v51 = vsub.f32 %v3234_v50, %v745_v1  ;;  %v809_v26 = vmul.f32 0.0004837513, %v713_v25 }
 0x1c8   :  { %v1034_v62 = vmul.f32 %v1002_v49, %v938_v3  ;;  %v1258_v12 = vmul.f32 %v2062_v18, %v938_v3  ;;  %v1834_v61 = vand.u32 2, %v1802_v58  ;;  %v873_v57 = vmul.f32 7.54979e-08, %v713_v25 }
 0x1c9   :  { %v1447_v40 = vadd.f32 1.0, %v1415_v39  ;;  %v2110_v59 = vtrunc.f32 %v713_v25  ;;  %v841_v30 = vsub.f32 %v777_v51, %v809_v26  ;;  %v684_v52 = vadd.f32 0.5, %v652_v14 }
 0x1ca   :  { %v2030_v4 = vadd.f32 -0.16666655, %v1034_v62  ;;  %v1290_v42 = vadd.f32 0.041666646, %v1258_v12  ;;  %v3322_v29 = vadd.f32 %v587_v23, %v2606_v34  ;;  %v1386_v38 = vmul.f32 0.5, %v938_v3 }
 0x1cb   :  { %v1607_v36 = vsel %vm3297_vm0, %v1447_v40, %v1159_v9  ;;  %v1639_v17 = vsel %vm3297_vm0, %v1159_v9, %v1447_v40  ;;  %v2111_v22 = vcvt.f32.s32 %v2110_v59  ;;  %v3324_v55 = vsub.f32 %v841_v30, %v873_v57 }
 0x1cc   :  { %v1735_v50 = vsub.f32 0.0, %v1607_v36  ;;  %v1895_v56 = vsub.f32 0.0, %v1639_v17  ;;  %v1098_v19 = vmul.f32 %v2030_v4, %v938_v3  ;;  %v1322_v27 = vmul.f32 %v1290_v42, %v938_v3 }
 0x1cd   :  { %v1513_v10 = vand.u32 3, %v2111_v22  ;;  %v716_v60 = vfloor.f32 %v684_v52  ;;  %vm3337_vm3 = vcmp.ne.s32.totalorder %v1546_v0, 0  ;;  %vm3341_vm4 = vcmp.ne.s32.totalorder %v1674_v20, 0  ;;  %v522_v52 = vpop.permute.xlu1 %521 }
 0x1ce   :  { %v1767_v54 = vsel %vm3303_vm1, %v1735_v50, %v1607_v36  ;;  %v1927_v8 = vsel %vm3307_vm2, %v1895_v56, %v1639_v17  ;;  %v1130_v33 = vmul.f32 %v1098_v19, %v3280_v6  ;;  %v1354_v25 = vmul.f32 %v1322_v27, %v938_v3  ;;  %v534_v56 = vpop.permute.xlu0 %533 }
 0x1cf   :  { %1959 = vst [vmem:[%s3810_s2 + $0xf0] sm:$0xff] %v1767_v54  ;;  %1991 = vst [vmem:[%s3810_s2 + $0xf8] sm:$0xff] %v1927_v8  ;;  %v937_v48 = vmul.f32 %v3324_v55, %v3324_v55  ;;  %v1801_v3 = vadd.s32 1, %v1513_v10  ;;  %vm3347_vm5 = vcmp.ne.s32.totalorder %v1834_v61, 0  ;;  %v748_v45 = vmul.f32 1.5703125, %v716_v60 }
 0x1d0   :  { %v1418_v21 = vsub.f32 %v1354_v25, %v1386_v38  ;;  %v651_v53 = vmul.f32 0.63661975, %v3322_v29  ;;  %v1545_v14 = vand.u32 1, %v1513_v10  ;;  %v1673_v47 = vand.u32 2, %v1513_v10 }
 0x1d1   :  { %v969_v35 = vmul.f32 -0.00019515296, %v937_v48  ;;  %v1193_v13 = vmul.f32 2.4433157e-05, %v937_v48  ;;  %v1162_v44 = vadd.f32 %v1130_v33, %v3280_v6  ;;  %v780_v46 = vsub.f32 %v3283_v15, %v748_v45 }
 0x1d2   :  { %v1450_v63 = vadd.f32 1.0, %v1418_v21  ;;  %v812_v58 = vmul.f32 0.0004837513, %v716_v60  ;;  %v1833_v18 = vand.u32 2, %v1801_v3  ;;  %v2116_v1 = vtrunc.f32 %v716_v60 }
 0x1d3   :  { %v1001_v23 = vadd.f32 0.008332161, %v969_v35  ;;  %v2061_v49 = vadd.f32 -0.0013887316, %v1193_v13  ;;  %v876_v20 = vmul.f32 7.54979e-08, %v716_v60  ;;  %v3362_v61 = vadd.f32 %v3313_v41, %v2619_v7 }
 0x1d4   :  { %v1610_v9 = vsel %vm3337_vm3, %v1450_v63, %v1162_v44  ;;  %v1642_v39 = vsel %vm3337_vm3, %v1162_v44, %v1450_v63  ;;  %v844_v0 = vsub.f32 %v780_v46, %v812_v58  ;;  %v2117_v15 = vcvt.f32.s32 %v2116_v1 }
 0x1d5   :  { %v1738_v62 = vsub.f32 0.0, %v1610_v9  ;;  %v1898_v12 = vsub.f32 0.0, %v1642_v39  ;;  %v1033_v51 = vmul.f32 %v1001_v23, %v937_v48  ;;  %v1257_v6 = vmul.f32 %v2061_v49, %v937_v48 }
 0x1d6   :  { %v3358_v26 = vsub.f32 %v844_v0, %v876_v20  ;;  %v683_v40 = vadd.f32 0.5, %v651_v53  ;;  %v1516_v41 = vand.u32 3, %v2117_v15  ;;  %v1385_v22 = vmul.f32 0.5, %v937_v48 }
 0x1d7   :  { %v1770_v57 = vsel %vm3341_vm4, %v1738_v62, %v1610_v9  ;;  %v1930_v59 = vsel %vm3347_vm5, %v1898_v12, %v1642_v39  ;;  %v2029_v4 = vadd.f32 -0.16666655, %v1033_v51  ;;  %v1289_v42 = vadd.f32 0.041666646, %v1257_v6 }
 0x1d8   :  { %1962 = vst [vmem:[%s3810_s2 + $0x120] sm:$0xff] %v1770_v57  ;;  %1994 = vst [vmem:[%s3810_s2 + $0x128] sm:$0xff] %v1930_v59  ;;  %v940_v7 = vmul.f32 %v3358_v26, %v3358_v26  ;;  %v715_v30 = vfloor.f32 %v683_v40  ;;  %vm3376_vm6 = vcmp.ne.s32.totalorder %v1545_v14, 0  ;;  %v654_v38 = vmul.f32 0.63661975, %v3362_v61 }
 0x1d9   :  { %v1097_v36 = vmul.f32 %v2029_v4, %v937_v48  ;;  %v1321_v17 = vmul.f32 %v1289_v42, %v937_v48  ;;  %vm3382_vm7 = vcmp.ne.s32.totalorder %v1673_v47, 0  ;;  %vm3386_vm8 = vcmp.ne.s32.totalorder %v1833_v18, 0 }
 0x1da   :  { %v972_v19 = vmul.f32 -0.00019515296, %v940_v7  ;;  %v1196_v27 = vmul.f32 2.4433157e-05, %v940_v7  ;;  %v1804_v33 = vadd.s32 1, %v1516_v41  ;;  %v589_v25 = vmul.f32 %v2656_v37, %v522_v52 }
 0x1db   :  { %v1129_v10 = vmul.f32 %v1097_v36, %v3324_v55  ;;  %v1353_v60 = vmul.f32 %v1321_v17, %v937_v48  ;;  %v747_v3 = vmul.f32 1.5703125, %v715_v30  ;;  %v3392_v21 = vmul.f32 %v2656_v37, %v534_v56 }
 0x1dc   :  { %v1004_v34 = vadd.f32 0.008332161, %v972_v19  ;;  %v2064_v24 = vadd.f32 -0.0013887316, %v1196_v27  ;;  %v1548_v45 = vand.u32 1, %v1516_v41  ;;  %v1676_v53 = vand.u32 2, %v1516_v41 }
 0x1dd   :  { %v1161_v2 = vadd.f32 %v1129_v10, %v3324_v55  ;;  %v1417_v48 = vsub.f32 %v1353_v60, %v1385_v22  ;;  %v779_v14 = vsub.f32 %v3322_v29, %v747_v3  ;;  %v811_v47 = vmul.f32 0.0004837513, %v715_v30 }
 0x1de   :  { %v1036_v35 = vmul.f32 %v1004_v34, %v940_v7  ;;  %v1260_v13 = vmul.f32 %v2064_v24, %v940_v7  ;;  %v1836_v63 = vand.u32 2, %v1804_v33  ;;  %v875_v46 = vmul.f32 7.54979e-08, %v715_v30 }
 0x1df   :  { %v1449_v44 = vadd.f32 1.0, %v1417_v48  ;;  %v2114_v58 = vtrunc.f32 %v715_v30  ;;  %v843_v18 = vsub.f32 %v779_v14, %v811_v47  ;;  %v686_v1 = vadd.f32 0.5, %v654_v38 }
 0x1e0   :  { %v2032_v23 = vadd.f32 -0.16666655, %v1036_v35  ;;  %v1292_v49 = vadd.f32 0.041666646, %v1260_v13  ;;  %v3401_v0 = vadd.f32 %v589_v25, %v2614_v28  ;;  %v1388_v51 = vmul.f32 0.5, %v940_v7 }
 0x1e1   :  { %v1609_v9 = vsel %vm3376_vm6, %v1449_v44, %v1161_v2  ;;  %v1641_v55 = vsel %vm3376_vm6, %v1161_v2, %v1449_v44  ;;  %v2115_v39 = vcvt.f32.s32 %v2114_v58  ;;  %v3403_v6 = vsub.f32 %v843_v18, %v875_v46 }
 0x1e2   :  { %v1737_v29 = vsub.f32 0.0, %v1609_v9  ;;  %v1897_v20 = vsub.f32 0.0, %v1641_v55  ;;  %v1100_v62 = vmul.f32 %v2032_v23, %v940_v7  ;;  %v1324_v12 = vmul.f32 %v1292_v49, %v940_v7  ;;  %v530_v49 = vpop.permute.xlu1 %529 }
 0x1e3   :  { %v1515_v15 = vand.u32 3, %v2115_v39  ;;  %v718_v40 = vfloor.f32 %v686_v1  ;;  %vm3416_vm9 = vcmp.ne.s32.totalorder %v1548_v45, 0  ;;  %vm3420_vm10 = vcmp.ne.s32.totalorder %v1676_v53, 0  ;;  %v542_v39 = vpop.permute.xlu0 %541 }
 0x1e4   :  { %v1769_v57 = vsel %vm3382_vm7, %v1737_v29, %v1609_v9  ;;  %v1929_v59 = vsel %vm3386_vm8, %v1897_v20, %v1641_v55  ;;  %v1132_v4 = vmul.f32 %v1100_v62, %v3358_v26  ;;  %v1356_v42 = vmul.f32 %v1324_v12, %v940_v7 }
 0x1e5   :  { %1961 = vst [vmem:[%s3810_s2 + $0x110] sm:$0xff] %v1769_v57  ;;  %1993 = vst [vmem:[%s3810_s2 + $0x118] sm:$0xff] %v1929_v59  ;;  %v939_v30 = vmul.f32 %v3403_v6, %v3403_v6  ;;  %v1803_v7 = vadd.s32 1, %v1515_v15  ;;  %vm3426_vm11 = vcmp.ne.s32.totalorder %v1836_v63, 0  ;;  %v750_v17 = vmul.f32 1.5703125, %v718_v40 }
 0x1e6   :  { %v1420_v52 = vsub.f32 %v1356_v42, %v1388_v51  ;;  %v653_v22 = vmul.f32 0.63661975, %v3401_v0  ;;  %v1547_v19 = vand.u32 1, %v1515_v15  ;;  %v1675_v27 = vand.u32 2, %v1515_v15 }
 0x1e7   :  { %v971_v50 = vmul.f32 -0.00019515296, %v939_v30  ;;  %v1195_v56 = vmul.f32 2.4433157e-05, %v939_v30  ;;  %v1164_v38 = vadd.f32 %v1132_v4, %v3358_v26  ;;  %v782_v60 = vsub.f32 %v3362_v61, %v750_v17 }
 0x1e8   :  { %v1452_v10 = vadd.f32 1.0, %v1420_v52  ;;  %v814_v54 = vmul.f32 0.0004837513, %v718_v40  ;;  %v1835_v25 = vand.u32 2, %v1803_v7  ;;  %v2120_v34 = vtrunc.f32 %v718_v40 }
 0x1e9   :  { %v1003_v8 = vadd.f32 0.008332161, %v971_v50  ;;  %v2063_v33 = vadd.f32 -0.0013887316, %v1195_v56  ;;  %v878_v48 = vmul.f32 7.54979e-08, %v718_v40  ;;  %v3441_v47 = vadd.f32 %v3392_v21, %v2627_v11 }
 0x1ea   :  { %v1612_v24 = vsel %vm3416_vm9, %v1452_v10, %v1164_v38  ;;  %v1644_v3 = vsel %vm3416_vm9, %v1164_v38, %v1452_v10  ;;  %v846_v2 = vsub.f32 %v782_v60, %v814_v54  ;;  %v2121_v61 = vcvt.f32.s32 %v2120_v34 }
 0x1eb   :  { %v1740_v45 = vsub.f32 0.0, %v1612_v24  ;;  %v1900_v53 = vsub.f32 0.0, %v1644_v3  ;;  %v1035_v35 = vmul.f32 %v1003_v8, %v939_v30  ;;  %v1259_v26 = vmul.f32 %v2063_v33, %v939_v30 }
 0x1ec   :  { %v3437_v13 = vsub.f32 %v846_v2, %v878_v48  ;;  %v685_v14 = vadd.f32 0.5, %v653_v22  ;;  %v1518_v21 = vand.u32 3, %v2121_v61  ;;  %v1387_v9 = vmul.f32 0.5, %v939_v30 }
 0x1ed   :  { %v1772_v44 = vsel %vm3420_vm10, %v1740_v45, %v1612_v24  ;;  %v1932_v63 = vsel %vm3426_vm11, %v1900_v53, %v1644_v3  ;;  %v2031_v46 = vadd.f32 -0.16666655, %v1035_v35  ;;  %v1291_v58 = vadd.f32 0.041666646, %v1259_v26 }
 0x1ee   :  { %1964 = vst [vmem:[%s3810_s2 + $0x140] sm:$0xff] %v1772_v44  ;;  %1996 = vst [vmem:[%s3810_s2 + $0x148] sm:$0xff] %v1932_v63  ;;  %v942_v11 = vmul.f32 %v3437_v13, %v3437_v13  ;;  %v717_v23 = vfloor.f32 %v685_v14  ;;  %vm3455_vm12 = vcmp.ne.s32.totalorder %v1547_v19, 0  ;;  %v656_v62 = vmul.f32 0.63661975, %v3441_v47 }
 0x1ef   :  { %v1099_v18 = vmul.f32 %v2031_v46, %v939_v30  ;;  %v1323_v1 = vmul.f32 %v1291_v58, %v939_v30  ;;  %vm3461_vm13 = vcmp.ne.s32.totalorder %v1675_v27, 0  ;;  %vm3465_vm14 = vcmp.ne.s32.totalorder %v1835_v25, 0 }
 0x1f0   :  { %v974_v29 = vmul.f32 -0.00019515296, %v942_v11  ;;  %v1198_v20 = vmul.f32 2.4433157e-05, %v942_v11  ;;  %v1806_v57 = vadd.s32 1, %v1518_v21  ;;  %v591_v59 = vmul.f32 %v2656_v37, %v530_v49 }
 0x1f1   :  { %v1131_v12 = vmul.f32 %v1099_v18, %v3403_v6  ;;  %v1355_v51 = vmul.f32 %v1323_v1, %v939_v30  ;;  %v749_v28 = vmul.f32 1.5703125, %v717_v23  ;;  %v3471_v41 = vmul.f32 %v2656_v37, %v542_v39 }
 0x1f2   :  { %v1006_v4 = vadd.f32 0.008332161, %v974_v29  ;;  %v2066_v42 = vadd.f32 -0.0013887316, %v1198_v20  ;;  %v1550_v52 = vand.u32 1, %v1518_v21  ;;  %v1678_v36 = vand.u32 2, %v1518_v21 }
 0x1f3   :  { %v1163_v7 = vadd.f32 %v1131_v12, %v3403_v6  ;;  %v1419_v30 = vsub.f32 %v1355_v51, %v1387_v9  ;;  %v781_v50 = vsub.f32 %v3401_v0, %v749_v28  ;;  %v813_v56 = vmul.f32 0.0004837513, %v717_v23 }
 0x1f4   :  { %v1038_v17 = vmul.f32 %v1006_v4, %v942_v11  ;;  %v1262_v22 = vmul.f32 %v2066_v42, %v942_v11  ;;  %v1838_v27 = vand.u32 2, %v1806_v57  ;;  %v877_v38 = vmul.f32 7.54979e-08, %v717_v23 }
 0x1f5   :  { %v1451_v19 = vadd.f32 1.0, %v1419_v30  ;;  %v2118_v10 = vtrunc.f32 %v717_v23  ;;  %v845_v8 = vsub.f32 %v781_v50, %v813_v56  ;;  %v688_v33 = vadd.f32 0.5, %v656_v62 }
 0x1f6   :  { %v2034_v60 = vadd.f32 -0.16666655, %v1038_v17  ;;  %v1294_v54 = vadd.f32 0.041666646, %v1262_v22  ;;  %v3480_v24 = vadd.f32 %v591_v59, %v2622_v32  ;;  %v1390_v45 = vmul.f32 0.5, %v942_v11 }
 0x1f7   :  { %v1611_v25 = vsel %vm3455_vm12, %v1451_v19, %v1163_v7  ;;  %v1643_v6 = vsel %vm3455_vm12, %v1163_v7, %v1451_v19  ;;  %v2119_v34 = vcvt.f32.s32 %v2118_v10  ;;  %v3482_v53 = vsub.f32 %v845_v8, %v877_v38  ;;  %v538_v10 = vpop.permute.xlu1 %537 }
 0x1f8   :  { %v1739_v0 = vsub.f32 0.0, %v1611_v25  ;;  %v1899_v3 = vsub.f32 0.0, %v1643_v6  ;;  %v1102_v2 = vmul.f32 %v2034_v60, %v942_v11  ;;  %v1326_v48 = vmul.f32 %v1294_v54, %v942_v11 }
 0x1f9   :  { %v1517_v35 = vand.u32 3, %v2119_v34  ;;  %v720_v26 = vfloor.f32 %v688_v33  ;;  %vm3495_vm15 = vcmp.ne.s32.totalorder %v1550_v52, 0  ;;  %vm3499_vm0 = vcmp.ne.s32.totalorder %v1678_v36, 0 }
 0x1fa   :  { %v1771_v61 = vsel %vm3461_vm13, %v1739_v0, %v1611_v25  ;;  %v1931_v14 = vsel %vm3465_vm14, %v1899_v3, %v1643_v6  ;;  %v1134_v44 = vmul.f32 %v1102_v2, %v3437_v13  ;;  %v1358_v63 = vmul.f32 %v1326_v48, %v942_v11  ;;  %v550_v25 = vpop.permute.xlu0 %549 }
 0x1fb   :  { %1963 = vst [vmem:[%s3810_s2 + $0x130] sm:$0xff] %v1771_v61  ;;  %1995 = vst [vmem:[%s3810_s2 + $0x138] sm:$0xff] %v1931_v14  ;;  %v941_v58 = vmul.f32 %v3482_v53, %v3482_v53  ;;  %v1805_v11 = vadd.s32 1, %v1517_v35  ;;  %vm3505_vm1 = vcmp.ne.s32.totalorder %v1838_v27, 0  ;;  %v752_v49 = vmul.f32 1.5703125, %v720_v26 }
 0x1fc   :  { %v1422_v21 = vsub.f32 %v1358_v63, %v1390_v45  ;;  %v655_v18 = vmul.f32 0.63661975, %v3480_v24  ;;  %v1549_v55 = vand.u32 1, %v1517_v35  ;;  %v1677_v39 = vand.u32 2, %v1517_v35 }
 0x1fd   :  { %v973_v1 = vmul.f32 -0.00019515296, %v941_v58  ;;  %v1197_v9 = vmul.f32 2.4433157e-05, %v941_v58  ;;  %v1166_v29 = vadd.f32 %v1134_v44, %v3437_v13  ;;  %v784_v62 = vsub.f32 %v3441_v47, %v752_v49 }
 0x1fe   :  { %v1454_v20 = vadd.f32 1.0, %v1422_v21  ;;  %v816_v12 = vmul.f32 0.0004837513, %v720_v26  ;;  %v1837_v40 = vand.u32 2, %v1805_v11  ;;  %v2124_v57 = vtrunc.f32 %v720_v26 }
 0x1ff   :  { %v1005_v51 = vadd.f32 0.008332161, %v973_v1  ;;  %v2065_v15 = vadd.f32 -0.0013887316, %v1197_v9  ;;  %v880_v28 = vmul.f32 7.54979e-08, %v720_v26  ;;  %v3520_v22 = vadd.f32 %v3471_v41, %v2635_v16 }
 0x200   :  { %v1614_v59 = vsel %vm3495_vm15, %v1454_v20, %v1166_v29  ;;  %v1646_v4 = vsel %vm3495_vm15, %v1166_v29, %v1454_v20  ;;  %v848_v42 = vsub.f32 %v784_v62, %v816_v12  ;;  %v2125_v47 = vcvt.f32.s32 %v2124_v57 }
 0x201   :  { %v1742_v7 = vsub.f32 0.0, %v1614_v59  ;;  %v1902_v30 = vsub.f32 0.0, %v1646_v4  ;;  %v1037_v52 = vmul.f32 %v1005_v51, %v941_v58  ;;  %v1261_v13 = vmul.f32 %v2065_v15, %v941_v58 }
 0x202   :  { %v3516_v36 = vsub.f32 %v848_v42, %v880_v28  ;;  %v687_v17 = vadd.f32 0.5, %v655_v18  ;;  %v1520_v41 = vand.u32 3, %v2125_v47  ;;  %v1389_v8 = vmul.f32 0.5, %v941_v58 }
 0x203   :  { %v1774_v50 = vsel %vm3499_vm0, %v1742_v7, %v1614_v59  ;;  %v1934_v56 = vsel %vm3505_vm1, %v1902_v30, %v1646_v4  ;;  %v2033_v19 = vadd.f32 -0.16666655, %v1037_v52  ;;  %v1293_v27 = vadd.f32 0.041666646, %v1261_v13 }
 0x204   :  { %1966 = vst [vmem:[%s3810_s2 + $0x160] sm:$0xff] %v1774_v50  ;;  %1998 = vst [vmem:[%s3810_s2 + $0x168] sm:$0xff] %v1934_v56  ;;  %v944_v16 = vmul.f32 %v3516_v36, %v3516_v36  ;;  %v719_v38 = vfloor.f32 %v687_v17  ;;  %vm3534_vm2 = vcmp.ne.s32.totalorder %v1549_v55, 0  ;;  %v658_v0 = vmul.f32 0.63661975, %v3520_v22 }
 0x205   :  { %v1101_v60 = vmul.f32 %v2033_v19, %v941_v58  ;;  %v1325_v54 = vmul.f32 %v1293_v27, %v941_v58  ;;  %vm3540_vm3 = vcmp.ne.s32.totalorder %v1677_v39, 0  ;;  %vm3544_vm4 = vcmp.ne.s32.totalorder %v1837_v40, 0 }
 0x206   :  { %v976_v6 = vmul.f32 -0.00019515296, %v944_v16  ;;  %v1200_v34 = vmul.f32 2.4433157e-05, %v944_v16  ;;  %v1808_v35 = vadd.s32 1, %v1520_v41  ;;  %v593_v26 = vmul.f32 %v2656_v37, %v538_v10 }
 0x207   :  { %v1133_v3 = vmul.f32 %v1101_v60, %v3482_v53  ;;  %v1357_v2 = vmul.f32 %v1325_v54, %v941_v58  ;;  %v751_v44 = vmul.f32 1.5703125, %v719_v38  ;;  %v3550_v63 = vmul.f32 %v2656_v37, %v550_v25 }
 0x208   :  { %v1008_v61 = vadd.f32 0.008332161, %v976_v6  ;;  %v2068_v14 = vadd.f32 -0.0013887316, %v1200_v34  ;;  %v1552_v58 = vand.u32 1, %v1520_v41  ;;  %v1680_v11 = vand.u32 2, %v1520_v41 }
 0x209   :  { %v1165_v32 = vadd.f32 %v1133_v3, %v3482_v53  ;;  %v1421_v46 = vsub.f32 %v1357_v2, %v1389_v8  ;;  %v783_v49 = vsub.f32 %v3480_v24, %v751_v44  ;;  %v815_v18 = vmul.f32 0.0004837513, %v719_v38 }
 0x20a   :  { %v1040_v21 = vmul.f32 %v1008_v61, %v944_v16  ;;  %v1264_v23 = vmul.f32 %v2068_v14, %v944_v16  ;;  %v1840_v9 = vand.u32 2, %v1808_v35  ;;  %v879_v55 = vmul.f32 7.54979e-08, %v719_v38 }
 0x20b   :  { %v1453_v1 = vadd.f32 1.0, %v1421_v46  ;;  %v2122_v39 = vtrunc.f32 %v719_v38  ;;  %v847_v62 = vsub.f32 %v783_v49, %v815_v18  ;;  %v690_v12 = vadd.f32 0.5, %v658_v0 }
 0x20c   :  { %v2036_v29 = vadd.f32 -0.16666655, %v1040_v21  ;;  %v1296_v20 = vadd.f32 0.041666646, %v1264_v23  ;;  %v3559_v40 = vadd.f32 %v593_v26, %v2630_v5  ;;  %v1392_v42 = vmul.f32 0.5, %v944_v16 }
 0x20d   :  { %v1613_v51 = vsel %vm3534_vm2, %v1453_v1, %v1165_v32  ;;  %v1645_v53 = vsel %vm3534_vm2, %v1165_v32, %v1453_v1  ;;  %v2123_v15 = vcvt.f32.s32 %v2122_v39  ;;  %v3561_v28 = vsub.f32 %v847_v62, %v879_v55  ;;  %v546_v39 = vpop.permute.xlu1 %545 }
 0x20e   :  { %v1741_v24 = vsub.f32 0.0, %v1613_v51  ;;  %v1901_v57 = vsub.f32 0.0, %v1645_v53  ;;  %v1104_v59 = vmul.f32 %v2036_v29, %v944_v16  ;;  %v1328_v4 = vmul.f32 %v1296_v20, %v944_v16 }
 0x20f   :  { %v1519_v7 = vand.u32 3, %v2123_v15  ;;  %v722_v30 = vfloor.f32 %v690_v12  ;;  %vm3574_vm5 = vcmp.ne.s32.totalorder %v1552_v58, 0  ;;  %vm3578_vm6 = vcmp.ne.s32.totalorder %v1680_v11, 0 }
 0x210   :  { %v1773_v52 = vsel %vm3540_vm3, %v1741_v24, %v1613_v51  ;;  %v1933_v13 = vsel %vm3544_vm4, %v1901_v57, %v1645_v53  ;;  %v1136_v47 = vmul.f32 %v1104_v59, %v3516_v36  ;;  %v1360_v17 = vmul.f32 %v1328_v4, %v944_v16 }
 0x211   :  { %1965 = vst [vmem:[%s3810_s2 + $0x150] sm:$0xff] %v1773_v52  ;;  %1997 = vst [vmem:[%s3810_s2 + $0x158] sm:$0xff] %v1933_v13  ;;  %v943_v56 = vmul.f32 %v3561_v28, %v3561_v28  ;;  %v1807_v19 = vadd.s32 1, %v1519_v7  ;;  %vm3584_vm7 = vcmp.ne.s32.totalorder %v1840_v9, 0  ;;  %v754_v41 = vmul.f32 1.5703125, %v722_v30 }
 0x212   :  { %v1424_v27 = vsub.f32 %v1360_v17, %v1392_v42  ;;  %v657_v38 = vmul.f32 0.63661975, %v3559_v40  ;;  %v1551_v54 = vand.u32 1, %v1519_v7  ;;  %v1679_v8 = vand.u32 2, %v1519_v7 }
 0x213   :  { %v975_v10 = vmul.f32 -0.00019515296, %v943_v56  ;;  %v1199_v60 = vmul.f32 2.4433157e-05, %v943_v56  ;;  %v1168_v33 = vadd.f32 %v1136_v47, %v3516_v36  ;;  %v786_v6 = vsub.f32 %v3520_v22, %v754_v41 }
 0x214   :  { %v1456_v25 = vadd.f32 1.0, %v1424_v27  ;;  %v818_v34 = vmul.f32 0.0004837513, %v722_v30  ;;  %v1839_v2 = vand.u32 2, %v1807_v19  ;;  %v2128_v48 = vtrunc.f32 %v722_v30 }
 0x215   :  { %v1007_v0 = vadd.f32 0.008332161, %v975_v10  ;;  %v2067_v3 = vadd.f32 -0.0013887316, %v1199_v60  ;;  %v882_v61 = vmul.f32 7.54979e-08, %v722_v30  ;;  %v3599_v11 = vadd.f32 %v3550_v63, %v2644_v43 }
 0x216   :  { %v1616_v45 = vsel %vm3574_vm5, %v1456_v25, %v1168_v33  ;;  %v1648_v35 = vsel %vm3574_vm5, %v1168_v33, %v1456_v25  ;;  %v850_v26 = vsub.f32 %v786_v6, %v818_v34  ;;  %v2129_v22 = vcvt.f32.s32 %v2128_v48 }
 0x217   :  { %v1744_v14 = vsub.f32 0.0, %v1616_v45  ;;  %v1904_v44 = vsub.f32 0.0, %v1648_v35  ;;  %v1039_v32 = vmul.f32 %v1007_v0, %v943_v56  ;;  %v1263_v36 = vmul.f32 %v2067_v3, %v943_v56 }
 0x218   :  { %v3595_v46 = vsub.f32 %v850_v26, %v882_v61  ;;  %v689_v58 = vadd.f32 0.5, %v657_v38  ;;  %v1522_v63 = vand.u32 3, %v2129_v22  ;;  %v1391_v29 = vmul.f32 0.5, %v943_v56 }
 0x219   :  { %v1776_v21 = vsel %vm3578_vm6, %v1744_v14, %v1616_v45  ;;  %v1936_v23 = vsel %vm3584_vm7, %v1904_v44, %v1648_v35  ;;  %v2035_v49 = vadd.f32 -0.16666655, %v1039_v32  ;;  %v1295_v18 = vadd.f32 0.041666646, %v1263_v36 }
 0x21a   :  { %1968 = vst [vmem:[%s3810_s2 + $0x180] sm:$0xff] %v1776_v21  ;;  %2000 = vst [vmem:[%s3810_s2 + $0x188] sm:$0xff] %v1936_v23  ;;  %v946_v43 = vmul.f32 %v3595_v46, %v3595_v46  ;;  %v721_v1 = vfloor.f32 %v689_v58  ;;  %vm3613_vm8 = vcmp.ne.s32.totalorder %v1551_v54, 0  ;;  %vm3618_vm9 = vcmp.ne.s32.totalorder %v1679_v8, 0 }
 0x21b   :  { %v1103_v9 = vmul.f32 %v2035_v49, %v943_v56  ;;  %v1327_v55 = vmul.f32 %v1295_v18, %v943_v56  ;;  %vm3622_vm10 = vcmp.ne.s32.totalorder %v1839_v2, 0  ;;  %v1810_v57 = vadd.s32 1, %v1522_v63  ;;  %v558_v2 = vpop.permute.xlu0 %557 }
 0x21c   :  { %v978_v62 = vmul.f32 -0.00019515296, %v946_v43  ;;  %v1202_v12 = vmul.f32 2.4433157e-05, %v946_v43  ;;  %v660_v59 = vmul.f32 0.63661975, %v3599_v11  ;;  %v595_v30 = vmul.f32 %v2656_v37, %v546_v39 }
 0x21d   :  { %v1135_v51 = vmul.f32 %v1103_v9, %v3561_v28  ;;  %v1359_v53 = vmul.f32 %v1327_v55, %v943_v56  ;;  %v753_v7 = vmul.f32 1.5703125, %v721_v1  ;;  %v1554_v47 = vand.u32 1, %v1522_v63 }
 0x21e   :  { %v1010_v4 = vadd.f32 0.008332161, %v978_v62  ;;  %v2070_v42 = vadd.f32 -0.0013887316, %v1202_v12  ;;  %v1682_v17 = vand.u32 2, %v1522_v63  ;;  %v817_v19 = vmul.f32 0.0004837513, %v721_v1 }
 0x21f   :  { %v1167_v52 = vadd.f32 %v1135_v51, %v3561_v28  ;;  %v1423_v13 = vsub.f32 %v1359_v53, %v1391_v29  ;;  %v785_v56 = vsub.f32 %v3559_v40, %v753_v7  ;;  %v1842_v16 = vand.u32 2, %v1810_v57 }
 0x220   :  { %v1042_v5 = vmul.f32 %v1010_v4, %v946_v43  ;;  %v1266_v50 = vmul.f32 %v2070_v42, %v946_v43  ;;  %v881_v41 = vmul.f32 7.54979e-08, %v721_v1  ;;  %v2126_v38 = vtrunc.f32 %v721_v1 }
 0x221   :  { %v1455_v27 = vadd.f32 1.0, %v1423_v13  ;;  %v849_v54 = vsub.f32 %v785_v56, %v817_v19  ;;  %v692_v8 = vadd.f32 0.5, %v660_v59  ;;  %v3635_v6 = vadd.f32 %v595_v30, %v2638_v31  ;;  %v3964_v13 = vld [vmem:[#allocation3_spill] sm:$0xff] }
 0x222   :  { %v2038_v10 = vadd.f32 -0.16666655, %v1042_v5  ;;  %v1298_v60 = vadd.f32 0.041666646, %v1266_v50  ;;  %v2127_v25 = vcvt.f32.s32 %v2126_v38  ;;  %v1394_v48 = vmul.f32 0.5, %v946_v43 }
 0x223   :  { %v1615_v33 = vsel %vm3613_vm8, %v1455_v27, %v1167_v52  ;;  %v1647_v28 = vsel %vm3613_vm8, %v1167_v52, %v1455_v27  ;;  %v3637_v45 = vsub.f32 %v849_v54, %v881_v41  ;;  %v724_v26 = vfloor.f32 %v692_v8 }
 0x224   :  { %v1743_v40 = vsub.f32 0.0, %v1615_v33  ;;  %v1903_v34 = vsub.f32 0.0, %v1647_v28  ;;  %v1106_v0 = vmul.f32 %v2038_v10, %v946_v43  ;;  %v1330_v3 = vmul.f32 %v1298_v60, %v946_v43 }
 0x225   :  { %v1521_v35 = vand.u32 3, %v2127_v25  ;;  %vm3650_vm11 = vcmp.ne.s32.totalorder %v1554_v47, 0  ;;  %vm3654_vm12 = vcmp.ne.s32.totalorder %v1682_v17, 0  ;;  %v945_v22 = vmul.f32 %v3637_v45, %v3637_v45 }
 0x226   :  { %v1775_v61 = vsel %vm3618_vm9, %v1743_v40, %v1615_v33  ;;  %v1935_v14 = vsel %vm3622_vm10, %v1903_v34, %v1647_v28  ;;  %v1138_v44 = vmul.f32 %v1106_v0, %v3595_v46  ;;  %v1362_v31 = vmul.f32 %v1330_v3, %v946_v43  ;;  %v554_v28 = vpop.permute.xlu1 %553 }
 0x227   :  { %1967 = vst [vmem:[%s3810_s2 + $0x170] sm:$0xff] %v1775_v61  ;;  %1999 = vst [vmem:[%s3810_s2 + $0x178] sm:$0xff] %v1935_v14  ;;  %v598_v58 = vmul.f32 %v2656_v37, %v558_v2  ;;  %vm3661_vm13 = vcmp.ne.s32.totalorder %v1842_v16, 0  ;;  %v756_v49 = vmul.f32 1.5703125, %v724_v26  ;;  %v659_v18 = vmul.f32 0.63661975, %v3635_v6 }
 0x228   :  { %v1426_v21 = vsub.f32 %v1362_v31, %v1394_v48  ;;  %v977_v43 = vmul.f32 -0.00019515296, %v945_v22  ;;  %v1201_v63 = vmul.f32 2.4433157e-05, %v945_v22  ;;  %v1553_v1 = vand.u32 1, %v1521_v35 }
 0x229   :  { %v1681_v9 = vand.u32 2, %v1521_v35  ;;  %v1170_v55 = vadd.f32 %v1138_v44, %v3595_v46  ;;  %v788_v29 = vsub.f32 %v3599_v11, %v756_v49  ;;  %v820_v20 = vmul.f32 0.0004837513, %v724_v26 }
 0x22a   :  { %v1458_v39 = vadd.f32 1.0, %v1426_v21  ;;  %v1009_v62 = vadd.f32 0.008332161, %v977_v43  ;;  %v2069_v12 = vadd.f32 -0.0013887316, %v1201_v63  ;;  %v1809_v51 = vadd.s32 1, %v1521_v35 }
 0x22b   :  { %v2132_v53 = vtrunc.f32 %v724_v26  ;;  %v852_v57 = vsub.f32 %v788_v29, %v820_v20  ;;  %v884_v59 = vmul.f32 7.54979e-08, %v724_v26  ;;  %v691_v52 = vadd.f32 0.5, %v659_v18 }
 0x22c   :  { %v1618_v15 = vsel %vm3650_vm11, %v1458_v39, %v1170_v55  ;;  %v1650_v24 = vsel %vm3650_vm11, %v1170_v55, %v1458_v39  ;;  %v1041_v7 = vmul.f32 %v1009_v62, %v945_v22  ;;  %v1265_v46 = vmul.f32 %v2069_v12, %v945_v22 }
 0x22d   :  { %v1746_v4 = vsub.f32 0.0, %v1618_v15  ;;  %v1906_v42 = vsub.f32 0.0, %v1650_v24  ;;  %v3672_v30 = vsub.f32 %v852_v57, %v884_v59  ;;  %v2133_v11 = vcvt.f32.s32 %v2132_v53 }
 0x22e   :  { %v3675_v47 = vadd.f32 %v598_v58, %v3964_v13  ;;  %v2037_v50 = vadd.f32 -0.16666655, %v1041_v7  ;;  %v1297_v56 = vadd.f32 0.041666646, %v1265_v46  ;;  %v1841_v19 = vand.u32 2, %v1809_v51  ;;  %v562_v7 = vpop.permute.xlu1 %561 }
 0x22f   :  { %v1778_v17 = vsel %vm3654_vm12, %v1746_v4, %v1618_v15  ;;  %v1938_v5 = vsel %vm3661_vm13, %v1906_v42, %v1650_v24  ;;  %v948_v27 = vmul.f32 %v3672_v30, %v3672_v30  ;;  %v723_v16 = vfloor.f32 %v691_v52  ;;  %v3971_v15 = vld [vmem:[#allocation2_spill] sm:$0xff] }
 0x230   :  { %1970 = vst [vmem:[%s3810_s2 + $0x1a0] sm:$0xff] %v1778_v17  ;;  %2002 = vst [vmem:[%s3810_s2 + $0x1a8] sm:$0xff] %v1938_v5  ;;  %v1105_v41 = vmul.f32 %v2037_v50, %v945_v22  ;;  %v1329_v38 = vmul.f32 %v1297_v56, %v945_v22  ;;  %v1524_v10 = vand.u32 3, %v2133_v11  ;;  %v1393_v60 = vmul.f32 0.5, %v945_v22 }
 0x231   :  { %vm3689_vm14 = vcmp.ne.s32.totalorder %v1553_v1, 0  ;;  %v980_v8 = vmul.f32 -0.00019515296, %v948_v27  ;;  %v1204_v33 = vmul.f32 2.4433157e-05, %v948_v27  ;;  %vm3694_vm15 = vcmp.ne.s32.totalorder %v1681_v9, 0 }
 0x232   :  { %v1137_v25 = vmul.f32 %v1105_v41, %v3637_v45  ;;  %v1361_v40 = vmul.f32 %v1329_v38, %v945_v22  ;;  %v662_v0 = vmul.f32 0.63661975, %v3675_v47  ;;  %vm3699_vm0 = vcmp.ne.s32.totalorder %v1841_v19, 0 }
 0x233   :  { %v1012_v2 = vadd.f32 0.008332161, %v980_v8  ;;  %v2072_v48 = vadd.f32 -0.0013887316, %v1204_v33  ;;  %v755_v35 = vmul.f32 1.5703125, %v723_v16  ;;  %v1556_v61 = vand.u32 1, %v1524_v10 }
 0x234   :  { %v1425_v26 = vsub.f32 %v1361_v40, %v1393_v60  ;;  %v1684_v14 = vand.u32 2, %v1524_v10  ;;  %v597_v44 = vmul.f32 %v2656_v37, %v554_v28  ;;  %v819_v22 = vmul.f32 0.0004837513, %v723_v16 }
 0x235   :  { %v1044_v31 = vmul.f32 %v1012_v2, %v948_v27  ;;  %v1268_v32 = vmul.f32 %v2072_v48, %v948_v27  ;;  %v787_v36 = vsub.f32 %v3635_v6, %v755_v35  ;;  %v1169_v58 = vadd.f32 %v1137_v25, %v3637_v45 }
 0x236   :  { %v1457_v21 = vadd.f32 1.0, %v1425_v26  ;;  %v1812_v23 = vadd.s32 1, %v1524_v10  ;;  %v2130_v49 = vtrunc.f32 %v723_v16  ;;  %v694_v1 = vadd.f32 0.5, %v662_v0  ;;  %v3978_v26 = vld [vmem:[#allocation4_spill] sm:$0xff] }
 0x237   :  { %v2040_v18 = vadd.f32 -0.16666655, %v1044_v31  ;;  %v1300_v43 = vadd.f32 0.041666646, %v1268_v32  ;;  %v851_v63 = vsub.f32 %v787_v36, %v819_v22  ;;  %v883_v39 = vmul.f32 7.54979e-08, %v723_v16 }
 0x238   :  { %v1617_v9 = vsel %vm3689_vm14, %v1457_v21, %v1169_v58  ;;  %v1649_v55 = vsel %vm3689_vm14, %v1169_v58, %v1457_v21  ;;  %v2131_v29 = vcvt.f32.s32 %v2130_v49  ;;  %v1396_v45 = vmul.f32 0.5, %v948_v27 }
 0x239   :  { %v1745_v20 = vsub.f32 0.0, %v1617_v9  ;;  %v1905_v6 = vsub.f32 0.0, %v1649_v55  ;;  %v1108_v62 = vmul.f32 %v2040_v18, %v948_v27  ;;  %v1332_v12 = vmul.f32 %v1300_v43, %v948_v27 }
 0x23a   :  { %v3710_v51 = vsub.f32 %v851_v63, %v883_v39  ;;  %v726_v53 = vfloor.f32 %v694_v1  ;;  %v3713_v24 = vadd.f32 %v597_v44, %v3971_v15  ;;  %v1844_v46 = vand.u32 2, %v1812_v23 }
 0x23b   :  { %v1777_v57 = vsel %vm3694_vm15, %v1745_v20, %v1617_v9  ;;  %v1937_v59 = vsel %vm3699_vm0, %v1905_v6, %v1649_v55  ;;  %v1140_v4 = vmul.f32 %v1108_v62, %v3672_v30  ;;  %v1364_v42 = vmul.f32 %v1332_v12, %v948_v27 }
 0x23c   :  { %1969 = vst [vmem:[%s3810_s2 + $0x190] sm:$0xff] %v1777_v57  ;;  %2001 = vst [vmem:[%s3810_s2 + $0x198] sm:$0xff] %v1937_v59  ;;  %v947_v11 = vmul.f32 %v3710_v51, %v3710_v51  ;;  %v1523_v52 = vand.u32 3, %v2131_v29  ;;  %vm3728_vm1 = vcmp.ne.s32.totalorder %v1556_v61, 0  ;;  %vm3732_vm2 = vcmp.ne.s32.totalorder %v1684_v14, 0 }
 0x23d   :  { %v1428_v13 = vsub.f32 %v1364_v42, %v1396_v45  ;;  %v758_v50 = vmul.f32 1.5703125, %v726_v53  ;;  %v661_v27 = vmul.f32 0.63661975, %v3713_v24  ;;  %v599_v16 = vmul.f32 %v2656_v37, %v562_v7 }
 0x23e   :  { %v979_v56 = vmul.f32 -0.00019515296, %v947_v11  ;;  %v1203_v19 = vmul.f32 2.4433157e-05, %v947_v11  ;;  %v1172_v41 = vadd.f32 %v1140_v4, %v3672_v30  ;;  %v822_v60 = vmul.f32 0.0004837513, %v726_v53 }
 0x23f   :  { %v1460_v38 = vadd.f32 1.0, %v1428_v13  ;;  %v790_v10 = vsub.f32 %v3675_v47, %v758_v50  ;;  %vm3740_vm3 = vcmp.ne.s32.totalorder %v1844_v46, 0  ;;  %v1811_v28 = vadd.s32 1, %v1523_v52 }
 0x240   :  { %v1011_v8 = vadd.f32 0.008332161, %v979_v56  ;;  %v2071_v33 = vadd.f32 -0.0013887316, %v1203_v19  ;;  %v886_v34 = vmul.f32 7.54979e-08, %v726_v53  ;;  %v2136_v48 = vtrunc.f32 %v726_v53 }
 0x241   :  { %v1620_v25 = vsel %vm3728_vm1, %v1460_v38, %v1172_v41  ;;  %v1652_v40 = vsel %vm3728_vm1, %v1172_v41, %v1460_v38  ;;  %v854_v37 = vsub.f32 %v790_v10, %v822_v60  ;;  %v693_v35 = vadd.f32 0.5, %v661_v27 }
 0x242   :  { %v1748_v30 = vsub.f32 0.0, %v1620_v25  ;;  %v1908_v0 = vsub.f32 0.0, %v1652_v40  ;;  %v1043_v3 = vmul.f32 %v1011_v8, %v947_v11  ;;  %v1267_v47 = vmul.f32 %v2071_v33, %v947_v11 }
 0x243   :  { %v3748_v2 = vsub.f32 %v854_v37, %v886_v34  ;;  %v3751_v61 = vadd.f32 %v599_v16, %v3978_v26  ;;  %v725_v22 = vfloor.f32 %v693_v35  ;;  %v1555_v23 = vand.u32 1, %v1523_v52 }
 0x244   :  { %v1780_v14 = vsel %vm3732_vm2, %v1748_v30, %v1620_v25  ;;  %v1940_v44 = vsel %vm3740_vm3, %v1908_v0, %v1652_v40  ;;  %v2039_v31 = vadd.f32 -0.16666655, %v1043_v3  ;;  %v1299_v32 = vadd.f32 0.041666646, %v1267_v47 }
 0x245   :  { %1972 = vst [vmem:[%s3810_s2 + $0x1c0] sm:$0xff] %v1780_v14  ;;  %2004 = vst [vmem:[%s3810_s2 + $0x1c8] sm:$0xff] %v1940_v44  ;;  %v950_v36 = vmul.f32 %v3748_v2, %v3748_v2  ;;  %v1683_v49 = vand.u32 2, %v1523_v52  ;;  %v1395_v18 = vmul.f32 0.5, %v947_v11  ;;  %v1843_v43 = vand.u32 2, %v1811_v28 }
 0x246   :  { %v1107_v58 = vmul.f32 %v2039_v31, %v947_v11  ;;  %v1331_v21 = vmul.f32 %v1299_v32, %v947_v11  ;;  %v2137_v39 = vcvt.f32.s32 %v2136_v48  ;;  %v663_v29 = vmul.f32 0.63661975, %v3751_v61 }
 0x247   :  { %v982_v63 = vmul.f32 -0.00019515296, %v950_v36  ;;  %v1206_v1 = vmul.f32 2.4433157e-05, %v950_v36  ;;  %v757_v62 = vmul.f32 1.5703125, %v725_v22  ;;  %vm1587_vm4 = vcmp.ne.s32.totalorder %v1555_v23, 0 }
 0x248   :  { %v1139_v9 = vmul.f32 %v1107_v58, %v3710_v51  ;;  %v1363_v55 = vmul.f32 %v1331_v21, %v947_v11  ;;  %vm3767_vm5 = vcmp.ne.s32.totalorder %v1683_v49, 0  ;;  %v821_v59 = vmul.f32 0.0004837513, %v725_v22 }
 0x249   :  { %v1014_v20 = vadd.f32 0.008332161, %v982_v63  ;;  %v2074_v6 = vadd.f32 -0.0013887316, %v1206_v1  ;;  %v789_v57 = vsub.f32 %v3713_v24, %v757_v62  ;;  %vm3773_vm6 = vcmp.ne.s32.totalorder %v1843_v43, 0 }
 0x24a   :  { %v1427_v12 = vsub.f32 %v1363_v55, %v1395_v18  ;;  %v1171_v4 = vadd.f32 %v1139_v9, %v3710_v51  ;;  %v1526_v46 = vand.u32 3, %v2137_v39  ;;  %v695_v17 = vadd.f32 0.5, %v663_v29 }
 0x24b   :  { %v1046_v53 = vmul.f32 %v1014_v20, %v950_v36  ;;  %v1270_v15 = vmul.f32 %v2074_v6, %v950_v36  ;;  %v853_v13 = vsub.f32 %v789_v57, %v821_v59  ;;  %v1398_v56 = vmul.f32 0.5, %v950_v36 }
 0x24c   :  { %v1459_v42 = vadd.f32 1.0, %v1427_v12  ;;  %v885_v19 = vmul.f32 7.54979e-08, %v725_v22  ;;  %v1814_v38 = vadd.s32 1, %v1526_v46  ;;  %v2134_v10 = vtrunc.f32 %v725_v22 }
 0x24d   :  { %v2042_v11 = vadd.f32 -0.16666655, %v1046_v53  ;;  %v1302_v52 = vadd.f32 0.041666646, %v1270_v15  ;;  %v727_v60 = vfloor.f32 %v695_v17  ;;  %v1558_v25 = vand.u32 1, %v1526_v46 }
 0x24e   :  { %v1619_v5 = vsel %vm1587_vm4, %v1459_v42, %v1171_v4  ;;  %v1651_v50 = vsel %vm1587_vm4, %v1171_v4, %v1459_v42  ;;  %v917_v51 = vsub.f32 %v853_v13, %v885_v19  ;;  %v1686_v40 = vand.u32 2, %v1526_v46 }
 0x24f   :  { %v1747_v27 = vsub.f32 0.0, %v1619_v5  ;;  %v1907_v16 = vsub.f32 0.0, %v1651_v50  ;;  %v1110_v24 = vmul.f32 %v2042_v11, %v950_v36  ;;  %v1334_v41 = vmul.f32 %v1302_v52, %v950_v36 }
 0x250   :  { %v949_v37 = vmul.f32 %v917_v51, %v917_v51  ;;  %v759_v30 = vmul.f32 1.5703125, %v727_v60  ;;  %v1846_v0 = vand.u32 2, %v1814_v38  ;;  %v2135_v48 = vcvt.f32.s32 %v2134_v10 }
 0x251   :  { %v1779_v54 = vsel %vm3767_vm5, %v1747_v27, %v1619_v5  ;;  %v1939_v8 = vsel %vm3773_vm6, %v1907_v16, %v1651_v50  ;;  %v1142_v33 = vmul.f32 %v1110_v24, %v3748_v2  ;;  %v1366_v28 = vmul.f32 %v1334_v41, %v950_v36 }
 0x252   :  { %1971 = vst [vmem:[%s3810_s2 + $0x1b0] sm:$0xff] %v1779_v54  ;;  %2003 = vst [vmem:[%s3810_s2 + $0x1b8] sm:$0xff] %v1939_v8  ;;  %v981_v3 = vmul.f32 -0.00019515296, %v949_v37  ;;  %v1205_v47 = vmul.f32 2.4433157e-05, %v949_v37  ;;  %v791_v14 = vsub.f32 %v3751_v61, %v759_v30 }
 0x253   :  { %v1430_v34 = vsub.f32 %v1366_v28, %v1398_v56  ;;  %v1174_v35 = vadd.f32 %v1142_v33, %v3748_v2  ;;  %v823_v44 = vmul.f32 0.0004837513, %v727_v60  ;;  %vm1590_vm7 = vcmp.ne.s32.totalorder %v1558_v25, 0 }
 0x254   :  { %vm1718_vm8 = vcmp.ne.s32.totalorder %v1686_v40, 0  ;;  %v1013_v31 = vadd.f32 0.008332161, %v981_v3  ;;  %v2073_v32 = vadd.f32 -0.0013887316, %v1205_v47  ;;  %vm1878_vm9 = vcmp.ne.s32.totalorder %v1846_v0, 0 }
 0x255   :  { %v1462_v26 = vadd.f32 1.0, %v1430_v34  ;;  %v855_v58 = vsub.f32 %v791_v14, %v823_v44  ;;  %v887_v21 = vmul.f32 7.54979e-08, %v727_v60  ;;  %v1525_v63 = vand.u32 3, %v2135_v48 }
 0x256   :  { %v1045_v18 = vmul.f32 %v1013_v31, %v949_v37  ;;  %v1269_v43 = vmul.f32 %v2073_v32, %v949_v37  ;;  %v2138_v2 = vtrunc.f32 %v727_v60  ;;  %v1397_v57 = vmul.f32 0.5, %v949_v37 }
 0x257   :  { %v1622_v36 = vsel %vm1590_vm7, %v1462_v26, %v1174_v35  ;;  %v1654_v22 = vsel %vm1590_vm7, %v1174_v35, %v1462_v26  ;;  %v919_v1 = vsub.f32 %v855_v58, %v887_v21  ;;  %v1813_v62 = vadd.s32 1, %v1525_v63 }
 0x258   :  { %v1750_v23 = vsub.f32 0.0, %v1622_v36  ;;  %v1910_v49 = vsub.f32 0.0, %v1654_v22  ;;  %v2041_v61 = vadd.f32 -0.16666655, %v1045_v18  ;;  %v1301_v39 = vadd.f32 0.041666646, %v1269_v43 }
 0x259   :  { %v951_v29 = vmul.f32 %v919_v1, %v919_v1  ;;  %v2139_v59 = vcvt.f32.s32 %v2138_v2  ;;  %v1557_v4 = vand.u32 1, %v1525_v63  ;;  %v1685_v11 = vand.u32 2, %v1525_v63 }
 0x25a   :  { %v1782_v9 = vsel %vm1718_vm8, %v1750_v23, %v1622_v36  ;;  %v1942_v55 = vsel %vm1878_vm9, %v1910_v49, %v1654_v22  ;;  %v1109_v20 = vmul.f32 %v2041_v61, %v949_v37  ;;  %v1333_v6 = vmul.f32 %v1301_v39, %v949_v37 }
 0x25b   :  { %1974 = vst [vmem:[%s3810_s2 + $0x1e0] sm:$0xff] %v1782_v9  ;;  %2006 = vst [vmem:[%s3810_s2 + $0x1e8] sm:$0xff] %v1942_v55  ;;  %v983_v12 = vmul.f32 -0.00019515296, %v951_v29  ;;  %v1207_v45 = vmul.f32 2.4433157e-05, %v951_v29 }
 0x25c   :  { %v1141_v53 = vmul.f32 %v1109_v20, %v917_v51  ;;  %v1365_v15 = vmul.f32 %v1333_v6, %v949_v37  ;;  %v1845_v50 = vand.u32 2, %v1813_v62  ;;  %v1527_v56 = vand.u32 3, %v2139_v59 }
 0x25d   :  { %v1015_v42 = vadd.f32 0.008332161, %v983_v12  ;;  %v2075_v7 = vadd.f32 -0.0013887316, %v1207_v45  ;;  %vm1589_vm10 = vcmp.ne.s32.totalorder %v1557_v4, 0  ;;  %vm1717_vm11 = vcmp.ne.s32.totalorder %v1685_v11, 0 }
 0x25e   :  { %v1429_v46 = vsub.f32 %v1365_v15, %v1397_v57  ;;  %v1173_v17 = vadd.f32 %v1141_v53, %v917_v51  ;;  %vm1877_vm12 = vcmp.ne.s32.totalorder %v1845_v50, 0  ;;  %v1399_v54 = vmul.f32 0.5, %v951_v29 }
 0x25f   :  { %v1047_v52 = vmul.f32 %v1015_v42, %v951_v29  ;;  %v1271_v13 = vmul.f32 %v2075_v7, %v951_v29  ;;  %v1815_v8 = vadd.s32 1, %v1527_v56  ;;  %v1559_v40 = vand.u32 1, %v1527_v56 }
 0x260   :  { %v1461_v5 = vadd.f32 1.0, %v1429_v46  ;;  %v1687_v0 = vand.u32 2, %v1527_v56 }
 0x261   :  { %v2043_v19 = vadd.f32 -0.16666655, %v1047_v52  ;;  %v1303_v27 = vadd.f32 0.041666646, %v1271_v13  ;;  %v1847_v3 = vand.u32 2, %v1815_v8  ;;  %vm1591_vm13 = vcmp.ne.s32.totalorder %v1559_v40, 0 }
 0x262   :  { %v1621_v16 = vsel %vm1589_vm10, %v1461_v5, %v1173_v17  ;;  %v1653_v24 = vsel %vm1589_vm10, %v1173_v17, %v1461_v5  ;;  %vm1719_vm14 = vcmp.ne.s32.totalorder %v1687_v0, 0 }
 0x263   :  { %v1749_v41 = vsub.f32 0.0, %v1621_v16  ;;  %v1909_v38 = vsub.f32 0.0, %v1653_v24  ;;  %v1111_v10 = vmul.f32 %v2043_v19, %v951_v29  ;;  %v1335_v60 = vmul.f32 %v1303_v27, %v951_v29 }
 0x264   :  { %vm1879_vm15 = vcmp.ne.s32.totalorder %v1847_v3, 0 }
 0x265   :  { %v1781_v33 = vsel %vm1717_vm11, %v1749_v41, %v1621_v16  ;;  %v1941_v28 = vsel %vm1877_vm12, %v1909_v38, %v1653_v24  ;;  %v1143_v25 = vmul.f32 %v1111_v10, %v919_v1  ;;  %v1367_v51 = vmul.f32 %v1335_v60, %v951_v29 }
 0x266   :  { %1973 = vst [vmem:[%s3810_s2 + $0x1d0] sm:$0xff] %v1781_v33  ;;  %2005 = vst [vmem:[%s3810_s2 + $0x1d8] sm:$0xff] %v1941_v28 }
 0x267   :  { %v1431_v37 = vsub.f32 %v1367_v51, %v1399_v54  ;;  %v1175_v34 = vadd.f32 %v1143_v25, %v919_v1 }
 0x269   :  { %v1463_v30 = vadd.f32 1.0, %v1431_v37 }
 0x26b   :  { %v1623_v47 = vsel %vm1591_vm13, %v1463_v30, %v1175_v34  ;;  %v1655_v48 = vsel %vm1591_vm13, %v1175_v34, %v1463_v30 }
 0x26c   :  { %v1751_v35 = vsub.f32 0.0, %v1623_v47  ;;  %v1911_v26 = vsub.f32 0.0, %v1655_v48 }
 0x26e   :  { %v1783_v14 = vsel %vm1719_vm14, %v1751_v35, %v1623_v47  ;;  %v1943_v44 = vsel %vm1879_vm15, %v1911_v26, %v1655_v48 }
 0x26f   :  { %1975 = vst [vmem:[%s3810_s2 + $0x1f0] sm:$0xff] %v1783_v14  ;;  %2007 = vst [vmem:[%s3810_s2 + $0x1f8] sm:$0xff] %v1943_v44 }

</bundles_post_ra>
